<compile_context>
chip_gen: v7x
topology: tpu7x:2x2x1
jax: 0.10.0
libtpu: 0.0.40
codegen_flags: <defaults>
</compile_context>

<pallas_src>
import functools

import jax
import jax.numpy as jnp
from jax.experimental import pallas as pl
from jax.experimental.pallas import tpu as pltpu


def _round_up(x, m):
    return (x + m - 1) // m * m


def _pick_tile(dim, target, unit=128):
    """Largest multiple of `unit` <= min(target, dim) dividing `dim` exactly;
    falls back to the capped target (the caller then zero-pads `dim`)."""
    cap = max(unit, (min(target, dim) // unit) * unit)
    for cand in range(cap, 0, -unit):
        if dim % cand == 0:
            return cand
    return cap


def _default_tiles():
    """Generation-gated tile targets and VMEM limit."""
    vmem_bytes = 64 << 20
    try:
        vmem_bytes = pltpu.get_tpu_info().vmem_capacity_bytes
    except Exception:  # not on TPU / API mismatch -> conservative (v7x) choice
        pass
    if vmem_bytes >= (96 << 20):
        # v5e / v6e: 128 MiB VMEM per TC -> big blocks, few grid steps.
        return 7168, 2048, 100 << 20
    # v7x: 64 MiB VMEM per TC -> cap w1 blocks at ~12 MiB.
    return 6272, 1024, 48 << 20


def yolo_detector_tiles(in_feat, hidden, *, max_tile_k=None, max_tile_n=None):
    gen_tk, gen_tn, vmem_limit = _default_tiles()
    tile_k = _pick_tile(in_feat, max_tile_k if max_tile_k else gen_tk)
    tile_n = _pick_tile(hidden, max_tile_n if max_tile_n else gen_tn)
    return tile_k, tile_n, vmem_limit


# --------------------- one-time weight prep (cold path) ---------------------
def prepare_detector_params(w1, b1, w2, b2, *, tile_k, tile_n):
    """Cast weights to bf16 ONCE (before any padding) and pad only where
    unavoidable.  Call once and reuse; keep this out of the per-call hot path."""
    in_feat, hidden = w1.shape
    out_dim = w2.shape[1]
    k_pad = _round_up(in_feat, tile_k)
    h_pad = _round_up(hidden, tile_n)
    o_pad = _round_up(out_dim, 128)              # 1470 -> 1536: lane-dense

    w1_b = w1.astype(jnp.bfloat16)               # cast BEFORE padding
    if (k_pad, h_pad) != (in_feat, hidden):
        w1_b = jnp.pad(w1_b, ((0, k_pad - in_feat), (0, h_pad - hidden)))

    b1_p = b1.astype(jnp.float32).reshape(1, hidden)
    if h_pad != hidden:
        b1_p = jnp.pad(b1_p, ((0, 0), (0, h_pad - hidden)))

    w2_b = w2.astype(jnp.bfloat16)
    if (h_pad, o_pad) != (hidden, out_dim):
        w2_b = jnp.pad(w2_b, ((0, h_pad - hidden), (0, o_pad - out_dim)))

    return dict(w1=w1_b, b1=b1_p, w2=w2_b, b2=b2.astype(jnp.float32),
                in_feat=in_feat, hidden=hidden, out_dim=out_dim,
                k_pad=k_pad, h_pad=h_pad, o_pad=o_pad,
                tile_k=tile_k, tile_n=tile_n)


# ------------------------- Pallas kernel (hot path) --------------------------
def _yolo_detector_kernel(x_ref, w1_ref, b1_ref, w2_ref, out_ref, h_acc, *,
                          tile_k):
    k = pl.program_id(1)                 # K (reduction) tile index, fastest
    nk = pl.num_programs(1)

    # fc1 partial product (MXU, f32 accumulate).  x is fully VMEM-resident;
    # slice the current K chunk in-kernel (start is a multiple of 128).
    start = pl.multiple_of(k * tile_k, 128)
    partial = jnp.dot(x_ref[:, pl.ds(start, tile_k)], w1_ref[...],
                      preferred_element_type=jnp.float32)

    @pl.when(k == 0)
    def _init():                         # assign, no zero-fill + RMW
        h_acc[...] = partial

    @pl.when(k > 0)
    def _accum():
        h_acc[...] += partial

    # K reduction done for this hidden tile: bias + LeakyReLU(0.1), then the
    # fused fc2 matmul writes this hidden tile's partial output slab.
    @pl.when(k == nk - 1)
    def _fc2():
        h = h_acc[...] + b1_ref[...]
        h = jnp.where(h >= 0, h, 0.1 * h)
        out_ref[...] = jnp.dot(h.astype(w2_ref.dtype), w2_ref[...],
                               preferred_element_type=jnp.float32)


# -------------------------------- Wrapper ------------------------------------
def yolo_detector(x_nchw, params, *, size, total, vmem_limit_bytes=None):
    """x_nchw: (N, C, H, W) float32.  Returns (N, size, size, total) float32."""
    n = x_nchw.shape[0]
    in_feat = x_nchw.shape[1] * x_nchw.shape[2] * x_nchw.shape[3]
    assert in_feat == params["in_feat"]
    out_dim = params["out_dim"]
    assert out_dim == size * size * total

    k_pad, h_pad, o_pad = params["k_pad"], params["h_pad"], params["o_pad"]
    tile_k, tile_n = params["tile_k"], params["tile_n"]
    n_pad = _round_up(max(n, 16), 16)            # bf16 packs 16 sublanes/vreg
    nj, nk = h_pad // tile_n, k_pad // tile_k

    # torch.nn.Flatten() on NCHW; cast to bf16 BEFORE zero-padding (x is tiny).
    x_flat = x_nchw.reshape(n, in_feat).astype(jnp.bfloat16)
    if (n_pad, k_pad) != (n, in_feat):
        x_flat = jnp.pad(x_flat, ((0, n_pad - n), (0, k_pad - in_feat)))

    if vmem_limit_bytes is None:
        vmem_limit_bytes = _default_tiles()[2]

    kernel = functools.partial(_yolo_detector_kernel, tile_k=tile_k)

    y_part = pl.pallas_call(
        kernel,
        out_shape=jax.ShapeDtypeStruct((nj, n_pad, o_pad), jnp.float32),
        grid=(nj, nk),                            # reduction axis (K) last
        in_specs=[
            pl.BlockSpec((n_pad, k_pad), lambda j, k: (0, 0)),    # x resident
            pl.BlockSpec((tile_k, tile_n), lambda j, k: (k, j)),  # w1 streamed
            pl.BlockSpec((1, tile_n), lambda j, k: (0, j)),       # b1
            pl.BlockSpec((tile_n, o_pad), lambda j, k: (j, 0)),   # w2 (per j)
        ],
        # One partial slab per hidden tile -> j is safely "parallel" (v7x 2 TCs).
        out_specs=pl.BlockSpec((None, n_pad, o_pad), lambda j, k: (j, 0, 0)),
        scratch_shapes=[pltpu.VMEM((n_pad, tile_n), jnp.float32)],  # fc1 acc
        compiler_params=pltpu.CompilerParams(
            dimension_semantics=("parallel", "arbitrary"),
            vmem_limit_bytes=vmem_limit_bytes,
        ),
    )(x_flat, params["w1"], params["b1"], params["w2"])

    # Tiny XLA epilogue: sum the per-hidden-tile slabs, strip padding, add the
    # fc2 bias, exact sigmoid, then torch.nn.Unflatten(1, (S, S, T)).
    y = jnp.sum(y_part, axis=0)[:n, :out_dim] + params["b2"]
    # TODO(synk): torch asserts not tensor.isnan().any() before sigmoid; there
    # is no clean in-graph assert, so callers should check `y` if they need it.
    y = jax.nn.sigmoid(y)
    return y.reshape(n, size, size, total)


# ------------------------- Pure-JAX reference (f32) --------------------------
def yolo_detector_ref(x_nchw, w1, b1, w2, b2, *, size, total):
    n = x_nchw.shape[0]
    x = x_nchw.reshape(n, -1)
    h = x @ w1 + b1
    h = jnp.where(h >= 0, h, 0.1 * h)
    y = h @ w2 + b2
    y = jax.nn.sigmoid(y)
    return y.reshape(n, size, size, total)


if __name__ == "__main__":
    # Small shapes consistent with the module's forward (real module:
    # C=1024, hidden=4096; scaled down for a quick run).  Explicit small tile
    # caps so both grid axes have >1 step (exercises K accumulation and the
    # per-hidden-tile partial-slab path).
    N, C, H, W = 2, 32, 7, 7
    HIDDEN = 512
    SIZE, BBOX, CLASSES = 7, 2, 20
    TOTAL = CLASSES + 5 * BBOX                   # 30
    IN_FEAT = C * H * W                          # 1568
    OUT_DIM = SIZE * SIZE * TOTAL                # 1470

    key = jax.random.PRNGKey(0)
    kx, kw1, kb1, kw2, kb2 = jax.random.split(key, 5)

    x = jax.random.normal(kx, (N, C, H, W), dtype=jnp.float32)

    # Deterministic PyTorch-style Linear init: U(-1/sqrt(fan_in), +1/sqrt(fan_in))
    lim1 = 1.0 / jnp.sqrt(IN_FEAT)
    w1 = jax.random.uniform(kw1, (IN_FEAT, HIDDEN), jnp.float32, -lim1, lim1)
    b1 = jax.random.uniform(kb1, (HIDDEN,), jnp.float32, -lim1, lim1)
    lim2 = 1.0 / jnp.sqrt(HIDDEN)
    w2 = jax.random.uniform(kw2, (HIDDEN, OUT_DIM), jnp.float32, -lim2, lim2)
    b2 = jax.random.uniform(kb2, (OUT_DIM,), jnp.float32, -lim2, lim2)

    tile_k, tile_n, vmem_limit = yolo_detector_tiles(
        IN_FEAT, HIDDEN, max_tile_k=512, max_tile_n=256)
    params = prepare_detector_params(w1, b1, w2, b2,
                                     tile_k=tile_k, tile_n=tile_n)

    out = yolo_detector(x, params, size=SIZE, total=TOTAL,
                        vmem_limit_bytes=vmem_limit)
    out = jax.block_until_ready(out)

    ref = yolo_detector_ref(x, w1, b1, w2, b2, size=SIZE, total=TOTAL)
    assert out.shape == (N, SIZE, SIZE, TOTAL), out.shape
    # Loose tolerance: weights/activations run through the MXU in bf16.
    assert jnp.allclose(out, ref, atol=2e-2, rtol=2e-2), "mismatch vs JAX reference"

    print("KERNEL_OK")
</pallas_src>

<mosaic_0001>
module attributes {stable_mosaic.version = 11 : i64} {
  func.func @_yolo_detector_kernel(%arg0: i32, %arg1: i32, %arg2: memref<16x2048xbf16, #tpu.memory_space<vmem>>, %arg3: memref<512x256xbf16, #tpu.memory_space<vmem>>, %arg4: memref<1x256xf32, #tpu.memory_space<vmem>>, %arg5: memref<256x1536xbf16, #tpu.memory_space<vmem>>, %arg6: memref<1x16x1536xf32, #tpu.memory_space<vmem>>, %arg7: memref<16x256xf32, #tpu.memory_space<vmem>>) attributes {dimension_semantics = [#tpu.dimension_semantics<parallel>, #tpu.dimension_semantics<arbitrary>], iteration_bounds = array<i64: 2, 4>, scalar_prefetch = 0 : i64, scratch_operands = 1 : i64, tpu.core_type = #tpu.core_type<tc>, window_params = [{pipeline_mode = #tpu.pipeline_mode<synchronous>, transform_indices = @transform_0, window_bounds = array<i64: 16, 2048>}, {transform_indices = @transform_1, window_bounds = array<i64: 512, 256>}, {transform_indices = @transform_2, window_bounds = array<i64: 1, 256>}, {transform_indices = @transform_3, window_bounds = array<i64: 256, 1536>}, {transform_indices = @transform_4, window_bounds = array<i64: 1, 16, 1536>}]} {
    %c512_i32 = arith.constant 512 : i32
    %0 = arith.muli %arg1, %c512_i32 : i32
    %1 = tpu.assume_multiple %0, 128 : i32
    %c0 = arith.constant 0 : index
    %2 = arith.index_cast %1 : i32 to index
    %3 = vector.load %arg2[%c0, %2] : memref<16x2048xbf16, #tpu.memory_space<vmem>>, vector<16x512xbf16>
    %c0_0 = arith.constant 0 : index
    %c0_1 = arith.constant 0 : index
    %4 = vector.load %arg3[%c0_0, %c0_1] : memref<512x256xbf16, #tpu.memory_space<vmem>>, vector<512x256xbf16>
    %cst = arith.constant dense<0.000000e+00> : vector<16x256xf32>
    %5 = tpu.matmul %3, %4, %cst {dimension_numbers = #tpu.dot_dimension_numbers<[1], [0], [0], [1], [0, 0, 1, 1], [], []>} : vector<16x512xbf16>, vector<512x256xbf16>, vector<16x256xf32> -> vector<16x256xf32>
    %c0_i32 = arith.constant 0 : i32
    %6 = arith.cmpi eq, %arg1, %c0_i32 : i32
    %7 = arith.extui %6 : i1 to i32
    %c0_i32_2 = arith.constant 0 : i32
    %8 = arith.cmpi ne, %7, %c0_i32_2 : i32
    scf.if %8 {
      %c0_6 = arith.constant 0 : index
      %c0_7 = arith.constant 0 : index
      %15 = vector.load %arg7[%c0_6, %c0_7] : memref<16x256xf32, #tpu.memory_space<vmem>>, vector<16x256xf32>
      tpu.vector_store %arg7[%c0_6, %c0_7], %5 {strides = array<i32>} : memref<16x256xf32, #tpu.memory_space<vmem>>, vector<16x256xf32>,
    } else {
    }
    %c0_i32_3 = arith.constant 0 : i32
    %9 = arith.cmpi sgt, %arg1, %c0_i32_3 : i32
    %10 = arith.extui %9 : i1 to i32
    %c0_i32_4 = arith.constant 0 : i32
    %11 = arith.cmpi ne, %10, %c0_i32_4 : i32
    scf.if %11 {
      %c0_6 = arith.constant 0 : index
      %c0_7 = arith.constant 0 : index
      %15 = vector.load %arg7[%c0_6, %c0_7] : memref<16x256xf32, #tpu.memory_space<vmem>>, vector<16x256xf32>
      %16 = arith.addf %15, %5 : vector<16x256xf32>
      %c0_8 = arith.constant 0 : index
      %c0_9 = arith.constant 0 : index
      %17 = vector.load %arg7[%c0_8, %c0_9] : memref<16x256xf32, #tpu.memory_space<vmem>>, vector<16x256xf32>
      tpu.vector_store %arg7[%c0_8, %c0_9], %16 {strides = array<i32>} : memref<16x256xf32, #tpu.memory_space<vmem>>, vector<16x256xf32>,
    } else {
    }
    %c3_i32 = arith.constant 3 : i32
    %12 = arith.cmpi eq, %arg1, %c3_i32 : i32
    %13 = arith.extui %12 : i1 to i32
    %c0_i32_5 = arith.constant 0 : i32
    %14 = arith.cmpi ne, %13, %c0_i32_5 : i32
    scf.if %14 {
      %c0_6 = arith.constant 0 : index
      %c0_7 = arith.constant 0 : index
      %15 = vector.load %arg7[%c0_6, %c0_7] : memref<16x256xf32, #tpu.memory_space<vmem>>, vector<16x256xf32>
      %c0_8 = arith.constant 0 : index
      %c0_9 = arith.constant 0 : index
      %16 = vector.load %arg4[%c0_8, %c0_9] : memref<1x256xf32, #tpu.memory_space<vmem>>, vector<1x256xf32>
      %17 = vector.broadcast %16 : vector<1x256xf32> to vector<16x256xf32>
      %18 = arith.addf %15, %17 : vector<16x256xf32>
      %cst_10 = arith.constant 0.000000e+00 : f32
      %19 = vector.broadcast %cst_10 : f32 to vector<16x256xf32>
      %20 = arith.cmpf oge, %18, %19 : vector<16x256xf32>
      %cst_11 = arith.constant 1.000000e-01 : f32
      %21 = vector.broadcast %cst_11 : f32 to vector<16x256xf32>
      %22 = arith.mulf %21, %18 : vector<16x256xf32>
      %23 = arith.select %20, %18, %22 : vector<16x256xi1>, vector<16x256xf32>
      %24 = arith.truncf %23 : vector<16x256xf32> to vector<16x256xbf16>
      %c0_12 = arith.constant 0 : index
      %c0_13 = arith.constant 0 : index
      %25 = vector.load %arg5[%c0_12, %c0_13] : memref<256x1536xbf16, #tpu.memory_space<vmem>>, vector<256x1536xbf16>
      %cst_14 = arith.constant dense<0.000000e+00> : vector<16x1536xf32>
      %26 = tpu.matmul %24, %25, %cst_14 {dimension_numbers = #tpu.dot_dimension_numbers<[1], [0], [0], [1], [0, 0, 1, 1], [], []>} : vector<16x256xbf16>, vector<256x1536xbf16>, vector<16x1536xf32> -> vector<16x1536xf32>
      %c0_15 = arith.constant 0 : index
      %c0_16 = arith.constant 0 : index
      %c0_17 = arith.constant 0 : index
      %27 = vector.load %arg6[%c0_15, %c0_16, %c0_17] : memref<1x16x1536xf32, #tpu.memory_space<vmem>>, vector<1x16x1536xf32>
      %28 = vector.shape_cast %27 : vector<1x16x1536xf32> to vector<16x1536xf32>
      %29 = vector.shape_cast %26 : vector<16x1536xf32> to vector<1x16x1536xf32>
      tpu.vector_store %arg6[%c0_15, %c0_16, %c0_17], %29 {strides = array<i32>} : memref<1x16x1536xf32, #tpu.memory_space<vmem>>, vector<1x16x1536xf32>,
    } else {
    }
    return
  }
  func.func @transform_0(%arg0: i32, %arg1: i32) -> (i32, i32) {
    %c0_i32 = arith.constant 0 : i32
    %c0_i32_0 = arith.constant 0 : i32
    %c0_i32_1 = arith.constant 0 : i32
    return %c0_i32, %c0_i32_0 : i32, i32
  }
  func.func @transform_1(%arg0: i32, %arg1: i32) -> (i32, i32) {
    %c0_i32 = arith.constant 0 : i32
    return %arg1, %arg0 : i32, i32
  }
  func.func @transform_2(%arg0: i32, %arg1: i32) -> (i32, i32) {
    %c0_i32 = arith.constant 0 : i32
    %c0_i32_0 = arith.constant 0 : i32
    return %c0_i32, %arg0 : i32, i32
  }
  func.func @transform_3(%arg0: i32, %arg1: i32) -> (i32, i32) {
    %c0_i32 = arith.constant 0 : i32
    %c0_i32_0 = arith.constant 0 : i32
    return %arg0, %c0_i32 : i32, i32
  }
  func.func @transform_4(%arg0: i32, %arg1: i32) -> (i32, i32, i32) {
    %c0_i32 = arith.constant 0 : i32
    %c0_i32_0 = arith.constant 0 : i32
    %c0_i32_1 = arith.constant 0 : i32
    return %arg0, %c0_i32, %c0_i32_0 : i32, i32, i32
  }
}

</mosaic_0001>

<bundles_post_ra>
// kernel: tpu_custom_call.1
= control target key start
LH: loop header
LB: loop body
LE: loop exit
PB: predicated region body
PF: predicated region fallthrough
CT: control target
= control target key end

     0   :  { %s4288_s0 = inlined_call_operand.hbm [shape: bf16[16,2048], index: 0, kind: input, shape index: {}]   ;;  %s4289_s1 = inlined_call_operand.hbm [shape: bf16[2048,512], index: 1, kind: input, shape index: {}]   ;;  %s4290_s2 = inlined_call_operand.hbm [shape: f32[1,512], index: 2, kind: input, shape index: {}]   ;;  %s4291_s3 = inlined_call_operand.hbm [shape: bf16[512,1536], index: 3, kind: input, shape index: {}]   ;;  %s4292_s4 = inlined_call_operand.hbm [shape: f32[2,16,1536], index: 4, kind: output, shape index: {}]  }
   0x1   :  { %4305 = sst [smem:[#allocation23_spill]] %s4289_s1 }
   0x2   :  { %4306 = sst [smem:[#allocation24_spill]] %s4292_s4 }
   0x3   :  { %9 = vsyncpa [#allocation4], 0 }
   0x4   :  { %10 = vsyncpa [#allocation7], 0 }
   0x5   :  { %12 = vsyncpa [#allocation7 + $0x1], 0 }
   0x6   :  { %13 = vsyncpa [#allocation10], 0 }
   0x7   :  { %15 = vsyncpa [#allocation10 + $0x1], 0 }
   0x8   :  { %16 = vsyncpa [#allocation5], 0 }
   0x9   :  { %18 = vsyncpa [#allocation5 + $0x1], 0  ;;  %s3589_s15 = smov 0   ;;  %s3591_s16 = smov 0  }
   0xa   :  { %s3593_s17 = smov 0   ;;  %s3595_s18 = smov 0  }
   0xb   :  { %s3597_s19 = smov 0   ;;  %s3599_s20 = smov 0  }
   0xc   :  { %s3601_s21 = smov 0   ;;  %s3603_s22 = smov 0  }
   0xd   :  { %s3605_s23 = smov 0   ;;  %s3607_s24 = smov 0  }
   0xe   :  { %s3609_s25 = smov 0  }
   0xf LB: > { %4307 = sst [smem:[#allocation17_spill]] %s3532_s21  ;;  %s33_s26 = sadd.s32 1, %s3540_s23  ;;  %s3548_s25 = sphi %s3609_s25, %s24_s25   ;;  %s3544_s24 = sphi %s3607_s24, %s4353_s24   ;;  %s3540_s23 = sphi %s3605_s23, %s4344_s23   ;;  %s3536_s22 = sphi %s3603_s22, %s4352_s22   ;;  %s3532_s21 = sphi %s3601_s21, %s4343_s21   ;;  %s3528_s20 = sphi %s3599_s20, %s4351_s20   ;;  %s3524_s19 = sphi %s3597_s19, %s4350_s19   ;;  %s3520_s18 = sphi %s3595_s18, %s4349_s18   ;;  %s3516_s17 = sphi %s3593_s17, %s4348_s17   ;;  %s3512_s16 = sphi %s3591_s16, %s4347_s16   ;;  %s3508_s15 = sphi %s3589_s15, %s4346_s15  }
  0x10   : > { %4308 = sst [smem:[#allocation18_spill]] %s3536_s22  ;;  %s36_s27 = sadd.s32 1, %s3544_s24 }
  0x11   : > { %4309 = sst [smem:[#allocation19_spill]] %s3540_s23  ;;  %p34_p0 = scmp.ge.s32.totalorder %s33_s26, 4 }
  0x12   : > { %s66_s28 = sadd.s32 1, %s3528_s20  ;;  %p73_p1 = scmp.ne.s32.totalorder %s3528_s20, %s3524_s19 }
  0x13   : > { %p4298_p2 = scmp.eq.s32.totalorder %s3548_s25, 0  ;;  %s4355_s26 = smov (%p34_p0, %s33_s26), 0 }
  0x14   : > { %4310 = sst [smem:[#allocation20_spill]] %s4355_s26  ;;  %s4357_s27 = smov (!%p34_p0, %s36_s27), %s3544_s24 }
  0x15   : > { %s61_s29 = ssub.s32 %s3540_s23, %s4355_s26  ;;  %p3657_p3 = por %p4298_p2, %p73_p1 }
  0x16   : > { %p38_p4 = scmp.ge.s32.totalorder %s4357_s27, 2  ;;  %p4297_p5 = scmp.lt.s32.totalorder %s3548_s25, 8 }
  0x17   : > { %s194_s5 = sand.u32 1, %s3548_s25   ;;  %s196_s6 = sand.u32 1, %s3528_s20  }
  0x18   : > { %s4359_s27 = smov (%p38_p4, %s4357_s27), 0  ;;  %s2486_s8 = sshll.u32 %s196_s6, 9 }
  0x19   : > { %4312 = sst [smem:[#allocation21_spill]] %s4359_s27  ;;  %s3668_s7 = ssub.s32 %s3544_s24, %s4359_s27 }
  0x1a   : > { %s63_s9 = sor.u32 %s3668_s7, %s61_s29  ;;  %s2488_s10 = sshll.u32 %s3544_s24, 1 }
  0x1b   : > { %p64_p7 = scmp.eq.s32.totalorder %s63_s9, 0  ;;  %s2769_s11 = sshll.u32 %s3540_s23, 8 }
  0x1c   : > { %s205_s13 = sadd.s32 %s2769_s11, %s2488_s10  ;;  %s198_s14 = scalar_lea.vmem [#allocation6], %s2486_s8 }
  0x1d   : > { %s3675_s12 = scalar_select %p64_p7, %s3528_s20, %s66_s28  }
  0x1e   : > { %s208_s26 = sshll.u32 %s198_s14, 4  ;;  %s2490_s4 = sshll.u32 %s205_s13, 6  ;;  %s3677_s26 = int_to_ptr.vmem [resolvable:$true] %s208_s26 }
  0x1f   : > { %4313 = sst [smem:[#allocation22_spill]] %s3675_s12  ;;  %s4314_s1 = sld [smem:[#allocation23_spill]] }
  0x20   : > { %p3688_p8 = pnand %p4297_p5, %p3657_p3  ;;  %s3692_s29 = scalar_lea.sflag [#allocation7], %s194_s5 }
  0x22   : > { %p3298_p10 = pneg %p3688_p8 }
  0x25   : > { %s3682_s27 = scalar_lea.hbm %s4314_s1, %s2490_s4  ;;  %s3301_s22 = scalar_lea.hbm %s4314_s1, 65536 }
  0x26   : > { %s3296_s6 = scalar_lea.hbm %s3682_s27, 8192  ;;  %p3302_p13 = scmp.lt.u32.totalorder %s3682_s27, %s4314_s1 }
  0x27   : > { %p3297_p9 = scmp.ne.s32.totalorder %s3682_s27, %s3296_s6  ;;  %p3303_p0 = scmp.lt.u32.totalorder %s3301_s22, %s3296_s6 }
  0x28   : > { %p3305_p3 = scmp.lt.u32.totalorder %s3296_s6, %s3682_s27 }
  0x29   : > { %p3299_p11 = pnand %p3298_p10, %p3297_p9  ;;  %p3304_p1 = por %p3303_p0, %p3302_p13 }
  0x2b   : > { %p3300_p12 = pneg %p3299_p11  ;;  %p3306_p4 = por %p3305_p3, %p3304_p1 }
  0x2d   : > { %p3307_p7 = pnand %p3306_p4, %p3300_p12 }
  0x2f   : > { %3310 = shalt.err (!%p3307_p7)
}
  0x30   : > { %s3311_s5 = scalar_lea.vmem %s3677_s26, 8192  ;;  %s3550_s9 = smov [#allocation6]  }
  0x31   : > { %p3312_p9 = scmp.ne.s32.totalorder %s3677_s26, %s3311_s5  ;;  %s3316_s10 = sshll.u32 %s3550_s9, 4  ;;  %s3317_s10 = int_to_ptr.vmem [resolvable:$false] %s3316_s10 }
  0x32   : > { %s3318_s11 = scalar_lea.vmem %s3317_s10, 16384  ;;  %p3319_p2 = scmp.lt.s32.totalorder %s3677_s26, %s3317_s10 }
  0x33   : > { %p3314_p11 = pnand %p3312_p9, %p3298_p10  ;;  %p3320_p13 = scmp.lt.s32.totalorder %s3318_s11, %s3311_s5 }
  0x35   : > { %p3315_p5 = pneg %p3314_p11  ;;  %p3321_p0 = por %p3320_p13, %p3319_p2 }
  0x37   : > { %p3322_p1 = pnand %p3321_p0, %p3315_p5 }
  0x39   : > { %3325 = shalt.err (!%p3322_p1)
}
  0x3a   : > { %s3551_s13 = smov 256   ;;  %s3552_s14 = smov 128  }
  0x3b   : > { %s3553_s6 = smov 8   ;;  %s3721_s4 = sadd.s32 4294967295, %s3548_s25  }
  0x3c   : > { %2799 = dma.hbm_to_vmem [thread:$0]  (!%p3688_p8), %s3682_s27, 8192, %s3677_s26, %s3692_s29, %s3551_s13, %s3552_s14, %s3553_s6  }
  0x3d   : > { %s2482_s21 = sadd.s32 4294967294, %s3548_s25   ;;  %p79_p2 = scmp.ne.s32.totalorder %s3524_s19, %s3520_s18 }
  0x3e   : > { %p4299_p5 = scmp.eq.s32.totalorder %s3721_s4, 0  ;;  %p105_p10 = scmp.ne.s32.totalorder %s3512_s16, %s3508_s15 }
  0x3f   : > { %p161_p8 = scmp.eq.s32.totalorder %s2482_s21, 7  ;;  %p2483_p7 = scmp.ge.s32.totalorder %s3548_s25, 1 }
  0x40   : > { %p3732_p3 = por %p4299_p5, %p79_p2  ;;  %p3738_p4 = por %p105_p10, %p4299_p5 }
  0x41   : > { %p3743_p9 = por %p161_p8, %p105_p10  ;;  %p168_p11 = scmp.lt.s32.totalorder %s3548_s25, 9 }
  0x42   : > { %s4316_s26 = scalar_select %p3732_p3, 1, 0 }
  0x43   : > { %s4317_s27 = scalar_select %p3738_p4, 1, 0 }
  0x44   : > { %s4318_s18 = scalar_select %p3743_p9, 1, 0 }
  0x45   : > { %p3748_p13 = pnand %p2483_p7, %p168_p11  ;;  %s3554_s22 = smov [#allocation3]  }
  0x46   : > { %s180_s30 = sshll.u32 %s3554_s22, 4  ;;  %s92_s9 = sadd.s32 1, %s3516_s17  ;;  %s3752_s30 = int_to_ptr.vmem [resolvable:$true] %s180_s30 }
  0x47   : > { %s4319_s28 = scalar_select %p3748_p13, 1, 0 }
  0x48   : > { %p2792_p0 = pneg %p3748_p13  ;;  %s3767_s10 = sand.u32 1, %s3516_s17  }
  0x49   : > { %s3326_s14 = scalar_lea.hbm %s4288_s0, 2048 }
  0x4a   : > { %p3759_p1 = pnand %p2792_p0, %p4299_p5  ;;  %p3327_p10 = scmp.ne.s32.totalorder %s4288_s0, %s3326_s14 }
  0x4b   : > { %p3333_p0 = scmp.lt.u32.totalorder %s3326_s14, %s4288_s0 }
  0x4c   : > { %p3328_p8 = pneg %p3759_p1 }
  0x4e   : > { %p3329_p7 = pnand %p3328_p8, %p3327_p10 }
  0x50   : > { %p3330_p11 = pneg %p3329_p7 }
  0x52   : > { %p3335_p5 = pnand %p3333_p0, %p3330_p11 }
  0x54   : > { %3338 = shalt.err (!%p3335_p5)
}
  0x55   : > { %s3339_s1 = scalar_lea.vmem %s3752_s30, 2048  ;;  %p3347_p9 = scmp.lt.s32.totalorder %s3752_s30, %s3752_s30 }
  0x56   : > { %p3340_p12 = scmp.ne.s32.totalorder %s3752_s30, %s3339_s1  ;;  %p3348_p4 = scmp.lt.s32.totalorder %s3339_s1, %s3339_s1 }
  0x58   : > { %p3342_p2 = pnand %p3340_p12, %p3328_p8  ;;  %p3349_p3 = por %p3348_p4, %p3347_p9 }
  0x5a   : > { %p3343_p6 = pneg %p3342_p2 }
  0x5c   : > { %p3350_p13 = pnand %p3349_p3, %p3343_p6 }
  0x5e   : > { %3353 = shalt.err (!%p3350_p13)
}
  0x5f   : > { %s3555_s11 = smov 1024   ;;  %s3556_s8 = smov 64  }
  0x60   : > { %2795 = dma.hbm_to_vmem [thread:$0]  (!%p3759_p1), %s4288_s0, 2048, %s3752_s30, [#allocation4], %s3555_s11, %s3555_s11, %s3556_s8  }
  0x61   : > { %p4321_p6 = scmp.eq.s32.totalorder %s3668_s7, 0  ;;  %p4322_p5 = scmp.eq.s32.totalorder %s3548_s25, 0 }
  0x62   : > { %p4323_p12 = scmp.ne.s32.totalorder %s3516_s17, %s3512_s16  ;;  %p4325_p9 = scmp.eq.s32.totalorder %s3721_s4, 7 }
  0x63   : > { %s3793_s14 = scalar_select %p4321_p6, %s3516_s17, %s92_s9  }
  0x64   : > { %p101_p3 = por %p4323_p12, %p4322_p5  ;;  %p4324_p4 = pmov %p4323_p12 }
  0x65   : > { %s2491_s21 = sshll.u32 %s3767_s10, 1  ;;  %s4327_s22 = sshll.u32 %s3544_s24, 5 }
  0x66   : > { %p3805_p13 = por %p4325_p9, %p4324_p4  ;;  %s3815_s12 = scalar_lea.hbm %s4290_s2, %s4327_s22 }
  0x67   : > { %p4328_p1 = scmp.lt.s32.totalorder %s3548_s25, 8  ;;  %s222_s30 = scalar_lea.vmem [#allocation8], %s2491_s21 }
  0x68   : > { %s4326_s6 = scalar_select %p3805_p13, 1, 0 }
  0x69   : > { %p3819_p2 = pnand %p4328_p1, %p101_p3  ;;  %s230_s9 = sshll.u32 %s222_s30, 4  ;;  %s231_s9 = int_to_ptr.vmem [resolvable:$true] %s230_s9 }
  0x6a   : > { %s3354_s11 = scalar_lea.hbm %s3815_s12, 32  ;;  %s3359_s1 = scalar_lea.hbm %s4290_s2, 64 }
  0x6b   : > { %p3355_p10 = scmp.ne.s32.totalorder %s3815_s12, %s3354_s11  ;;  %p3356_p8 = pneg %p3819_p2 }
  0x6c   : > { %p3360_p0 = scmp.lt.u32.totalorder %s3815_s12, %s4290_s2  ;;  %p3361_p6 = scmp.lt.u32.totalorder %s3359_s1, %s3354_s11 }
  0x6d   : > { %p3357_p7 = pnand %p3356_p8, %p3355_p10  ;;  %p3363_p12 = scmp.lt.u32.totalorder %s3354_s11, %s3815_s12 }
  0x6e   : > { %p3362_p5 = por %p3361_p6, %p3360_p0 }
  0x6f   : > { %p3358_p11 = pneg %p3357_p7 }
  0x70   : > { %p3364_p3 = por %p3363_p12, %p3362_p5 }
  0x72   : > { %p3365_p4 = pnand %p3364_p3, %p3358_p11 }
  0x74   : > { %3368 = shalt.err (!%p3365_p4)
}
  0x75   : > { %s3369_s21 = scalar_lea.vmem %s231_s9, 32  ;;  %s3557_s5 = smov [#allocation8]  }
  0x76   : > { %p3370_p9 = scmp.ne.s32.totalorder %s231_s9, %s3369_s21  ;;  %s3374_s30 = sshll.u32 %s3557_s5, 4  ;;  %s3375_s30 = int_to_ptr.vmem [resolvable:$false] %s3374_s30 }
  0x77   : > { %s3376_s23 = scalar_lea.vmem %s3375_s30, 64  ;;  %p3377_p7 = scmp.lt.s32.totalorder %s231_s9, %s3375_s30 }
  0x78   : > { %p3372_p1 = pnand %p3370_p9, %p3356_p8  ;;  %p3378_p13 = scmp.lt.s32.totalorder %s3376_s23, %s3369_s21 }
  0x7a   : > { %p3373_p10 = pneg %p3372_p1  ;;  %p3379_p0 = por %p3378_p13, %p3377_p7 }
  0x7c   : > { %p3380_p6 = pnand %p3379_p0, %p3373_p10 }
  0x7e   : > { %3383 = shalt.err (!%p3380_p6)
}
  0x7f   : > { %2802 = dma.hbm_to_vmem [thread:$0]  (!%p3819_p2), %s3815_s12, 32, %s231_s9, %s3692_s29  }
  0x80   : > { %s2775_s11 = smul.u32 1536, %s3767_s10  ;;  %s238_s30 = scalar_lea.sflag [#allocation10], %s3767_s10 }
  0x81   : > { %s2776_s8 = smul.u32 24576, %s3544_s24  ;;  %s3389_s9 = scalar_lea.hbm %s4291_s3, 49152 }
  0x82   : > { %s241_s21 = scalar_lea.vmem [#allocation9], %s2775_s11 }
  0x83   : > { %s3850_s22 = scalar_lea.hbm %s4291_s3, %s2776_s8  ;;  %s249_s5 = sshll.u32 %s241_s21, 4  ;;  %s3852_s5 = int_to_ptr.vmem [resolvable:$true] %s249_s5 }
  0x84   : > { %s3384_s23 = scalar_lea.hbm %s3850_s22, 24576  ;;  %p3390_p12 = scmp.lt.u32.totalorder %s3850_s22, %s4291_s3 }
  0x85   : > { %p3385_p13 = scmp.ne.s32.totalorder %s3850_s22, %s3384_s23  ;;  %p3391_p3 = scmp.lt.u32.totalorder %s3389_s9, %s3384_s23 }
  0x86   : > { %p3393_p9 = scmp.lt.u32.totalorder %s3384_s23, %s3850_s22 }
  0x87   : > { %p3387_p11 = pnand %p3385_p13, %p3356_p8  ;;  %p3392_p4 = por %p3391_p3, %p3390_p12 }
  0x89   : > { %p3388_p5 = pneg %p3387_p11  ;;  %p3394_p1 = por %p3393_p9, %p3392_p4 }
  0x8b   : > { %p3395_p10 = pnand %p3394_p1, %p3388_p5 }
  0x8d   : > { %3398 = shalt.err (!%p3395_p10)
}
  0x8e   : > { %s3399_s11 = scalar_lea.vmem %s3852_s5, 24576  ;;  %s3558_s13 = smov [#allocation9]  }
  0x8f   : > { %p3400_p7 = scmp.ne.s32.totalorder %s3852_s5, %s3399_s11  ;;  %s3404_s21 = sshll.u32 %s3558_s13, 4  ;;  %s3405_s21 = int_to_ptr.vmem [resolvable:$false] %s3404_s21 }
  0x90   : > { %s3406_s12 = scalar_lea.vmem %s3405_s21, 49152  ;;  %p3407_p13 = scmp.lt.s32.totalorder %s3852_s5, %s3405_s21 }
  0x91   : > { %p3402_p0 = pnand %p3400_p7, %p3356_p8  ;;  %p3408_p11 = scmp.lt.s32.totalorder %s3406_s12, %s3399_s11 }
  0x93   : > { %p3403_p6 = pneg %p3402_p0  ;;  %p3409_p12 = por %p3408_p11, %p3407_p13 }
  0x95   : > { %p3410_p3 = pnand %p3409_p12, %p3403_p6 }
  0x97   : > { %3413 = shalt.err (!%p3410_p3)
}
  0x98   : > { %s3559_s23 = smov 768   ;;  %s3560_s29 = smov 48  }
  0x99   : > { %2805 = dma.hbm_to_vmem [thread:$0]  (!%p3819_p2), %s3850_s22, 24576, %s3852_s5, %s238_s30, %s3559_s23, %s3559_s23, %s3560_s29  }
  0x9a   : > { %p4330_p8 = scmp.ne.s32.totalorder %s4319_s28, 0 }
  0x9b   : > { %p4331_p5 = scmp.eq.s32.totalorder (!%p4330_p8), %s3721_s4, 0 }
  0x9c   : > { %261 = sbr.rel (%p4330_p8) target bundleno = 919 (0x397), region = 36 }
  0xa3   : > { %3487 = dma.done.wait (%p4331_p5), [#allocation4], 2048   ;;  %p4332_p4 = pmov %p4331_p5 }
  0xa4   : > { %s267_s9 = sand.u32 1, %s3721_s4   ;;  %s269_s8 = sand.u32 1, %s3524_s19  }
  0xa5   : > { %3489 = vsyncadd (%p4332_p4), [#allocation4], 4294965248  ;;  %s2499_s1 = sshll.u32 %s269_s8, 9  ;;  %s268_s11 = scalar_lea.sflag [#allocation7], %s267_s9 }
  0xa6   : > { %s3888_s13 = scalar_lea.vmem [#allocation6], %s2499_s1  ;;  %p4333_p9 = scmp.ne.s32.totalorder %s4316_s26, 0 }
  0xa8   : > { %3491 = dma.done.wait (%p4333_p9), %s268_s11, 8192  }
  0xa9   : > { %3493 = vsyncadd (%p4333_p9), %s268_s11, 4294959104  ;;  %s3895_s28 = sand.u32 1, %s3512_s16   ;;  %p4334_p2 = scmp.ne.s32.totalorder %s4317_s27, 0 }
  0xaa   : > { %s2500_s10 = sshll.u32 %s3895_s28, 1 }
  0xab   : > { %s3898_s7 = scalar_lea.vmem [#allocation8], %s2500_s10 }
  0xac   : > { %3495 = dma.done.wait (%p4334_p2), %s268_s11, 32  }
  0xad   : > { %3497 = vsyncadd (%p4334_p2), %s268_s11, 4294967264  ;;  %s2777_s4 = smul.u32 1536, %s3895_s28  ;;  %s286_s22 = scalar_lea.sflag [#allocation10], %s3895_s28 }
  0xaf   : > { %s3906_s26 = scalar_lea.vmem [#allocation9], %s2777_s4 }
  0xb0   : > { %3499 = dma.done.wait (%p4334_p2), %s286_s22, 24576  }
  0xb1   : > { %3501 = vsyncadd (%p4334_p2), %s286_s22, 4294942720  ;;  %s2778_s5 = smul.u32 192, %s3895_s28  ;;  %v2912_v0 = vld [vmem:[%s3888_s13 + $0x4] ss:$8 sps:$4 sm:$0xff]   ;;  %v2916_v2 = vld [vmem:[%s3888_s13] ss:$8 sps:$4 sm:$0xff]  }
  0xb2   : > { %v2914_v1 = vld [vmem:[%s3888_s13 + $0x104] ss:$8 sps:$4 sm:$0xff]   ;;  %741 = vmatprep.subr.bf16.mxu1 %v2912_v0  ;;  %v2917_v3 = vld [vmem:[%s3888_s13 + $0x100] ss:$8 sps:$4 sm:$0xff]   ;;  %v2918_v4 = vld [vmem:[%s3888_s13 + $0x14] ss:$8 sps:$4 sm:$0xff]  }
  0xb3   : > { %784 = vmatprep.subr.bf16.mxu0 %v2914_v1  ;;  %742 = vmatpush1.bf16.msra.mxu1 %v2916_v2  ;;  %v2920_v5 = vld [vmem:[%s3888_s13 + $0x114] ss:$8 sps:$4 sm:$0xff]   ;;  %v2922_v6 = vld [vmem:[%s3888_s13 + $0x10] ss:$8 sps:$4 sm:$0xff]   ;;  %v2924_v8 = vld [vmem:[%s3888_s13 + $0x24] ss:$8 sps:$4 sm:$0xff]  }
  0xb4   : > { %785 = vmatpush1.bf16.msra.mxu0 %v2917_v3  ;;  %743 = vmatprep.subr.bf16.mxu1 %v2918_v4  ;;  %v2923_v7 = vld [vmem:[%s3888_s13 + $0x110] ss:$8 sps:$4 sm:$0xff]   ;;  %v2926_v9 = vld [vmem:[%s3888_s13 + $0x124] ss:$8 sps:$4 sm:$0xff]   ;;  %v2928_v10 = vld [vmem:[%s3888_s13 + $0x20] ss:$8 sps:$4 sm:$0xff]  }
  0xb5   : > { %786 = vmatprep.subr.bf16.mxu0 %v2920_v5  ;;  %v2929_v11 = vld [vmem:[%s3888_s13 + $0x120] ss:$8 sps:$4 sm:$0xff]   ;;  %v2930_v12 = vld [vmem:[%s3888_s13 + $0x34] ss:$8 sps:$4 sm:$0xff]   ;;  %v2934_v14 = vld [vmem:[%s3888_s13 + $0x30] ss:$8 sps:$4 sm:$0xff]  }
  0xb6   : > { %v2932_v13 = vld [vmem:[%s3888_s13 + $0x134] ss:$8 sps:$4 sm:$0xff]   ;;  %v2935_v15 = vld [vmem:[%s3888_s13 + $0x130] ss:$8 sps:$4 sm:$0xff]   ;;  %v2936_v16 = vld [vmem:[%s3888_s13 + $0x44] ss:$8 sps:$4 sm:$0xff]  }
  0xb7   : > { %744 = vmatpush1.bf16.msra.mxu1 %v2922_v6  ;;  %v2938_v17 = vld [vmem:[%s3888_s13 + $0x144] ss:$8 sps:$4 sm:$0xff]   ;;  %v2940_v18 = vld [vmem:[%s3888_s13 + $0x40] ss:$8 sps:$4 sm:$0xff]   ;;  %v2942_v20 = vld [vmem:[%s3888_s13 + $0x54] ss:$8 sps:$4 sm:$0xff]  }
  0xb8   : > { %787 = vmatpush1.bf16.msra.mxu0 %v2923_v7  ;;  %745 = vmatprep.subr.bf16.mxu1 %v2924_v8  ;;  %v2941_v19 = vld [vmem:[%s3888_s13 + $0x140] ss:$8 sps:$4 sm:$0xff]   ;;  %v2944_v21 = vld [vmem:[%s3888_s13 + $0x154] ss:$8 sps:$4 sm:$0xff]   ;;  %v2946_v22 = vld [vmem:[%s3888_s13 + $0x50] ss:$8 sps:$4 sm:$0xff]  }
  0xb9   : > { %788 = vmatprep.subr.bf16.mxu0 %v2926_v9  ;;  %v2947_v23 = vld [vmem:[%s3888_s13 + $0x150] ss:$8 sps:$4 sm:$0xff]   ;;  %v2948_v24 = vld [vmem:[%s3888_s13 + $0x64] ss:$8 sps:$4 sm:$0xff]   ;;  %v2952_v26 = vld [vmem:[%s3888_s13 + $0x60] ss:$8 sps:$4 sm:$0xff]  }
  0xba   : > { %v2950_v25 = vld [vmem:[%s3888_s13 + $0x164] ss:$8 sps:$4 sm:$0xff]   ;;  %s4335_s27 = sld [smem:[#allocation17_spill]]  ;;  %v2953_v27 = vld [vmem:[%s3888_s13 + $0x160] ss:$8 sps:$4 sm:$0xff]   ;;  %s3980_s29 = scalar_lea.vmem [#allocation11], %s2778_s5 }
  0xbb   : > { %746 = vmatpush1.bf16.msra.mxu1 %v2928_v10  ;;  %v2954_v28 = vld [vmem:[%s3888_s13 + $0x74] ss:$8 sps:$4 sm:$0xff]   ;;  %v2958_v30 = vld [vmem:[%s3888_s13 + $0x70] ss:$8 sps:$4 sm:$0xff]   ;;  %v2960_v32 = vld [vmem:[%s3888_s13 + $0x84] ss:$8 sps:$4 sm:$0xff]  }
  0xbc   : > { %789 = vmatpush1.bf16.msra.mxu0 %v2929_v11  ;;  %747 = vmatprep.subr.bf16.mxu1 %v2930_v12  ;;  %v2956_v29 = vld [vmem:[%s3888_s13 + $0x174] ss:$8 sps:$4 sm:$0xff]   ;;  %v2959_v31 = vld [vmem:[%s3888_s13 + $0x170] ss:$8 sps:$4 sm:$0xff]   ;;  %v2962_v33 = vld [vmem:[%s3888_s13 + $0x184] ss:$8 sps:$4 sm:$0xff]  }
  0xbd   : > { %790 = vmatprep.subr.bf16.mxu0 %v2932_v13  ;;  %v2964_v34 = vld [vmem:[%s3888_s13 + $0x80] ss:$8 sps:$4 sm:$0xff]   ;;  %v2966_v36 = vld [vmem:[%s3888_s13 + $0x94] ss:$8 sps:$4 sm:$0xff]   ;;  %v2970_v38 = vld [vmem:[%s3888_s13 + $0x90] ss:$8 sps:$4 sm:$0xff]  }
  0xbe   : > { %v2965_v35 = vld [vmem:[%s3888_s13 + $0x180] ss:$8 sps:$4 sm:$0xff]   ;;  %v2968_v37 = vld [vmem:[%s3888_s13 + $0x194] ss:$8 sps:$4 sm:$0xff]   ;;  %v2971_v39 = vld [vmem:[%s3888_s13 + $0x190] ss:$8 sps:$4 sm:$0xff]  }
  0xbf   : > { %748 = vmatpush1.bf16.msra.mxu1 %v2934_v14  ;;  %v2972_v40 = vld [vmem:[%s3888_s13 + $0xa4] ss:$8 sps:$4 sm:$0xff]   ;;  %v2976_v42 = vld [vmem:[%s3888_s13 + $0xa0] ss:$8 sps:$4 sm:$0xff]   ;;  %v2978_v44 = vld [vmem:[%s3888_s13 + $0xb4] ss:$8 sps:$4 sm:$0xff]  }
  0xc0   : > { %791 = vmatpush1.bf16.msra.mxu0 %v2935_v15  ;;  %749 = vmatprep.subr.bf16.mxu1 %v2936_v16  ;;  %s2501_s30 = sshll.u32 %s4335_s27, 9  ;;  %v2974_v41 = vld [vmem:[%s3888_s13 + $0x1a4] ss:$8 sps:$4 sm:$0xff]   ;;  %v2977_v43 = vld [vmem:[%s3888_s13 + $0x1a0] ss:$8 sps:$4 sm:$0xff]   ;;  %p2571_p1 = scmp.ne.s32.totalorder %s4335_s27, 0 }
  0xc1   : > { %792 = vmatprep.subr.bf16.mxu0 %v2938_v17  ;;  %s329_s21 = sshra.s32 %s2501_s30, 7  ;;  %v2980_v45 = vld [vmem:[%s3888_s13 + $0x1b4] ss:$8 sps:$4 sm:$0xff]   ;;  %v2982_v50 = vld [vmem:[%s3888_s13 + $0xb0] ss:$8 sps:$4 sm:$0xff]  }
  0xc2   : > { %s2502_s12 = sshll.u32 %s329_s21, 2  ;;  %v2983_v51 = vld [vmem:[%s3888_s13 + $0x1b0] ss:$8 sps:$4 sm:$0xff]   ;;  %v2984_v53 = vld [vmem:[%s3888_s13 + $0xc4] ss:$8 sps:$4 sm:$0xff]  }
  0xc3   : > { %750 = vmatpush1.bf16.msra.mxu1 %v2940_v18  ;;  %s332_s23 = scalar_lea.vmem [#allocation3], %s2502_s12  ;;  %v2986_v54 = vld [vmem:[%s3888_s13 + $0x1c4] ss:$8 sps:$4 sm:$0xff]   ;;  %v2988_v56 = vld [vmem:[%s3888_s13 + $0xc0] ss:$8 sps:$4 sm:$0xff]  }
  0xc4   : > { %793 = vmatpush1.bf16.msra.mxu0 %v2941_v19  ;;  %751 = vmatprep.subr.bf16.mxu1 %v2942_v20  ;;  %v333_v46 = vld [vmem:[%s332_s23] sm:$0xff]  ;;  %v334_v48 = vld [vmem:[%s332_s23 + $0x8] sm:$0xff]  ;;  %v2990_v58 = vld [vmem:[%s3888_s13 + $0xd4] ss:$8 sps:$4 sm:$0xff]  }
  0xc5   : > { %794 = vmatprep.subr.bf16.mxu0 %v2944_v21  ;;  %v335_v47 = vld [vmem:[%s332_s23 + $0x40] sm:$0xff]  ;;  %v336_v49 = vld [vmem:[%s332_s23 + $0x48] sm:$0xff]  ;;  %v2992_v59 = vld [vmem:[%s3888_s13 + $0x1d4] ss:$8 sps:$4 sm:$0xff]  }
  0xc6   : > { %v2504_v52 = vcombine.high %v333_v46, %v335_v47  ;;  %v2506_v55 = vcombine.high %v334_v48, %v336_v49  ;;  %v2989_v57 = vld [vmem:[%s3888_s13 + $0x1c0] ss:$8 sps:$4 sm:$0xff]   ;;  %v2994_v60 = vld [vmem:[%s3888_s13 + $0xd0] ss:$8 sps:$4 sm:$0xff]   ;;  %v2996_v62 = vld [vmem:[%s3888_s13 + $0xe4] ss:$8 sps:$4 sm:$0xff]   ;;  %v2503_v6 = vcombine.low %v333_v46, %v335_v47  ;;  %v2505_v7 = vcombine.low %v334_v48, %v336_v49 }
  0xc7   : > { %752 = vmatpush1.bf16.msra.mxu1 %v2946_v22  ;;  %v2995_v61 = vld [vmem:[%s3888_s13 + $0x1d0] ss:$8 sps:$4 sm:$0xff]   ;;  %v2998_v63 = vld [vmem:[%s3888_s13 + $0x1e4] ss:$8 sps:$4 sm:$0xff]   ;;  %v3000_v0 = vld [vmem:[%s3888_s13 + $0xe0] ss:$8 sps:$4 sm:$0xff]  }
  0xc8   : > { %795 = vmatpush1.bf16.msra.mxu0 %v2947_v23  ;;  %753 = vmatprep.subr.bf16.mxu1 %v2948_v24  ;;  %v3001_v1 = vld [vmem:[%s3888_s13 + $0x1e0] ss:$8 sps:$4 sm:$0xff]   ;;  %v3002_v2 = vld [vmem:[%s3888_s13 + $0xf4] ss:$8 sps:$4 sm:$0xff]   ;;  %v3006_v4 = vld [vmem:[%s3888_s13 + $0xf0] ss:$8 sps:$4 sm:$0xff]  }
  0xc9   : > { %796 = vmatprep.subr.bf16.mxu0 %v2950_v25  ;;  %773 = vmatprep.mubr.bf16.mxu1 %v2504_v52  ;;  %v3004_v3 = vld [vmem:[%s3888_s13 + $0x1f4] ss:$8 sps:$4 sm:$0xff]   ;;  %v3007_v5 = vld [vmem:[%s3888_s13 + $0x1f0] ss:$8 sps:$4 sm:$0xff]  }
  0xca   : > { %816 = vmatprep.mubr.bf16.mxu0 %v2506_v55 }
  0xcb   : > { %754 = vmatpush1.bf16.msra.mxu1 %v2952_v26 }
  0xcc   : > { %797 = vmatpush1.bf16.msra.mxu0 %v2953_v27  ;;  %755 = vmatprep.subr.bf16.mxu1 %v2954_v28 }
  0xcd   : > { %798 = vmatprep.subr.bf16.mxu0 %v2956_v29 }
  0xcf   : > { %756 = vmatpush1.bf16.msra.mxu1 %v2958_v30 }
  0xd0   : > { %799 = vmatpush1.bf16.msra.mxu0 %v2959_v31  ;;  %757 = vmatprep.subr.bf16.mxu1 %v2960_v32 }
  0xd1   : > { %800 = vmatprep.subr.bf16.mxu0 %v2962_v33 }
  0xd3   : > { %758 = vmatpush1.bf16.msra.mxu1 %v2964_v34 }
  0xd4   : > { %801 = vmatpush1.bf16.msra.mxu0 %v2965_v35  ;;  %759 = vmatprep.subr.bf16.mxu1 %v2966_v36 }
  0xd5   : > { %802 = vmatprep.subr.bf16.mxu0 %v2968_v37 }
  0xd7   : > { %760 = vmatpush1.bf16.msra.mxu1 %v2970_v38 }
  0xd8   : > { %803 = vmatpush1.bf16.msra.mxu0 %v2971_v39  ;;  %761 = vmatprep.subr.bf16.mxu1 %v2972_v40 }
  0xd9   : > { %804 = vmatprep.subr.bf16.mxu0 %v2974_v41 }
  0xdb   : > { %762 = vmatpush1.bf16.msra.mxu1 %v2976_v42 }
  0xdc   : > { %805 = vmatpush1.bf16.msra.mxu0 %v2977_v43  ;;  %763 = vmatprep.subr.bf16.mxu1 %v2978_v44 }
  0xdd   : > { %806 = vmatprep.subr.bf16.mxu0 %v2980_v45 }
  0xdf   : > { %764 = vmatpush1.bf16.msra.mxu1 %v2982_v50 }
  0xe0   : > { %807 = vmatpush1.bf16.msra.mxu0 %v2983_v51  ;;  %765 = vmatprep.subr.bf16.mxu1 %v2984_v53 }
  0xe1   : > { %808 = vmatprep.subr.bf16.mxu0 %v2986_v54 }
  0xe3   : > { %766 = vmatpush1.bf16.msra.mxu1 %v2988_v56 }
  0xe4   : > { %809 = vmatpush1.bf16.msra.mxu0 %v2989_v57  ;;  %767 = vmatprep.subr.bf16.mxu1 %v2990_v58 }
  0xe5   : > { %810 = vmatprep.subr.bf16.mxu0 %v2992_v59 }
  0xe7   : > { %768 = vmatpush1.bf16.msra.mxu1 %v2994_v60 }
  0xe8   : > { %811 = vmatpush1.bf16.msra.mxu0 %v2995_v61  ;;  %769 = vmatprep.subr.bf16.mxu1 %v2996_v62 }
  0xe9   : > { %812 = vmatprep.subr.bf16.mxu0 %v2998_v63 }
  0xeb   : > { %770 = vmatpush1.bf16.msra.mxu1 %v3000_v0 }
  0xec   : > { %813 = vmatpush1.bf16.msra.mxu0 %v3001_v1  ;;  %771 = vmatprep.subr.bf16.mxu1 %v3002_v2 }
  0xed   : > { %814 = vmatprep.subr.bf16.mxu0 %v3004_v3 }
  0xef   : > { %772 = vmatpush1.bf16.msra.mxu1 %v3006_v4 }
  0xf0   : > { %815 = vmatpush1.bf16.msra.mxu0 %v3007_v5 }
  0xf2   : > { %774 = vmatmul.mubr.bf16.vlgmr.msra.gmra.mrb[0].mxu1 %v2503_v6 }
  0xf3   : > { %817 = vmatmul.mubr.bf16.vlgmr.msra.gmra.mrb[0].mxu0 %v2505_v7 }
 0x1c4   : > { %830 = sbr.rel (%p2571_p1) target bundleno = 461 (0x1cd), region = 56 }
 0x1c5   : > { %v775_v8 = vpop.f32.mrb[0].mxu1 }
 0x1c6   : > { %v818_v9 = vpop.f32.mrb[0].mxu0  ;;  %v777_v11 = vpop.f32.mrb[1].mxu1 }
 0x1c7   : > { %v819_v10 = vadd.f32 %v818_v9, %v775_v8  ;;  %v820_v12 = vpop.f32.mrb[1].mxu0  ;;  %v779_v14 = vpop.f32.mrb[2].mxu1 }
 0x1c8   : > { %v821_v13 = vadd.f32 %v820_v12, %v777_v11  ;;  %v822_v15 = vpop.f32.mrb[2].mxu0  ;;  %v781_v17 = vpop.f32.mrb[3].mxu1 }
 0x1c9   : > { %v823_v16 = vadd.f32 %v822_v15, %v779_v14  ;;  %v824_v18 = vpop.f32.mrb[3].mxu0  ;;  %831 = vst [vmem:[#allocation2] sm:$0xff] (!%p2571_p1), %v819_v10 }
 0x1ca   : > { %v825_v19 = vadd.f32 %v824_v18, %v781_v17  ;;  %832 = vst [vmem:[#allocation2 + $0x8] sm:$0xff] (!%p2571_p1), %v821_v13 }
 0x1cb   : > { %833 = vst [vmem:[#allocation2 + $0x10] sm:$0xff] %v823_v16 }
 0x1cc   : > { %834 = vst [vmem:[#allocation2 + $0x18] sm:$0xff] %v825_v19 }
 0x1cd PF: > { %s4336_s9 = sld [smem:[#allocation17_spill]] }
 0x1d3   : > { %p2572_p10 = scmp.le.s32.totalorder %s4336_s9, 0 }
 0x1d4   : > { %v839_v20 = vld [vmem:[#allocation2] sm:$0xff] (!%p2572_p10)  ;;  %v840_v21 = vld [vmem:[#allocation2 + $0x8] sm:$0xff] (!%p2572_p10)  ;;  %v841_v22 = vld [vmem:[#allocation2 + $0x10] sm:$0xff] (!%p2572_p10) }
 0x1d5   : > { %838 = sbr.rel (%p2572_p10) target bundleno = 476 (0x1dc), region = 60  ;;  %v843_v23 = vadd.f32 (!%p2572_p10), %v839_v20, %v819_v10  ;;  %v844_v24 = vadd.f32 (!%p2572_p10), %v840_v21, %v821_v13  ;;  %v845_v25 = vadd.f32 (!%p2572_p10), %v841_v22, %v823_v16  ;;  %v842_v26 = vld [vmem:[#allocation2 + $0x18] sm:$0xff] (!%p2572_p10) }
 0x1d6   : > { %v846_v27 = vadd.f32 (!%p2572_p10), %v842_v26, %v825_v19 }
 0x1d7   : > { %847 = vst [vmem:[#allocation2] sm:$0xff] (!%p2572_p10), %v843_v23  ;;  %848 = vst [vmem:[#allocation2 + $0x8] sm:$0xff] (!%p2572_p10), %v844_v24 }
 0x1d8   : > { %849 = vst [vmem:[#allocation2 + $0x10] sm:$0xff] (!%p2572_p10), %v845_v25  ;;  %850 = vst [vmem:[#allocation2 + $0x18] sm:$0xff] (!%p2572_p10), %v846_v27 }
 0x1dc PF: > { %s4337_s8 = sld [smem:[#allocation17_spill]] }
 0x1e2   : > { %p2573_p7 = scmp.ne.s32.totalorder %s4337_s8, 3 }
 0x1e3   : > { %v3008_v28 = vld [vmem:[%s3906_s26 + $0x4] ss:$48 sps:$4 sm:$0xff] (!%p2573_p7)   ;;  %v3010_v29 = vld [vmem:[%s3906_s26 + $0xc] ss:$48 sps:$4 sm:$0xff] (!%p2573_p7)   ;;  %v3012_v30 = vld [vmem:[%s3906_s26] ss:$48 sps:$4 sm:$0xff] (!%p2573_p7)   ;;  %v861_v1 = vlaneseq (!%p2573_p7) }
 0x1e4   : > { %854 = sbr.rel (%p2573_p7) target bundleno = 892 (0x37c), region = 64  ;;  %2041 = vmatprep.subr.bf16.mxu0 (!%p2573_p7), %v3008_v28  ;;  %v3013_v31 = vld [vmem:[%s3906_s26 + $0x8] ss:$48 sps:$4 sm:$0xff] (!%p2573_p7)   ;;  %2084 = vmatprep.subr.bf16.mxu1 (!%p2573_p7), %v3010_v29  ;;  %v3014_v32 = vld [vmem:[%s3906_s26 + $0x64] ss:$48 sps:$4 sm:$0xff] (!%p2573_p7)  }
 0x1e5   : > { %2042 = vmatpush1.bf16.msra.mxu0 (!%p2573_p7), %v3012_v30  ;;  %2085 = vmatpush1.bf16.msra.mxu1 (!%p2573_p7), %v3013_v31  ;;  %v3016_v33 = vld [vmem:[%s3906_s26 + $0x6c] ss:$48 sps:$4 sm:$0xff] (!%p2573_p7)   ;;  %v3018_v34 = vld [vmem:[%s3906_s26 + $0x60] ss:$48 sps:$4 sm:$0xff] (!%p2573_p7)   ;;  %v3019_v35 = vld [vmem:[%s3906_s26 + $0x68] ss:$48 sps:$4 sm:$0xff] (!%p2573_p7)  }
 0x1e6   : > { %2043 = vmatprep.subr.bf16.mxu0 (!%p2573_p7), %v3014_v32  ;;  %2086 = vmatprep.subr.bf16.mxu1 (!%p2573_p7), %v3016_v33  ;;  %v3020_v36 = vld [vmem:[%s3906_s26 + $0xc4] ss:$48 sps:$4 sm:$0xff] (!%p2573_p7)   ;;  %v3022_v37 = vld [vmem:[%s3906_s26 + $0xcc] ss:$48 sps:$4 sm:$0xff] (!%p2573_p7)   ;;  %v3024_v38 = vld [vmem:[%s3906_s26 + $0xc0] ss:$48 sps:$4 sm:$0xff] (!%p2573_p7)  }
 0x1e7   : > { %v3025_v39 = vld [vmem:[%s3906_s26 + $0xc8] ss:$48 sps:$4 sm:$0xff] (!%p2573_p7)   ;;  %v3026_v40 = vld [vmem:[%s3906_s26 + $0x124] ss:$48 sps:$4 sm:$0xff] (!%p2573_p7)   ;;  %v3028_v41 = vld [vmem:[%s3906_s26 + $0x12c] ss:$48 sps:$4 sm:$0xff] (!%p2573_p7)  }
 0x1e8   : > { %v3030_v42 = vld [vmem:[%s3906_s26 + $0x120] ss:$48 sps:$4 sm:$0xff] (!%p2573_p7)   ;;  %v3031_v43 = vld [vmem:[%s3906_s26 + $0x128] ss:$48 sps:$4 sm:$0xff] (!%p2573_p7)   ;;  %v3032_v44 = vld [vmem:[%s3906_s26 + $0x184] ss:$48 sps:$4 sm:$0xff] (!%p2573_p7)  }
 0x1e9   : > { %2044 = vmatpush1.bf16.msra.mxu0 (!%p2573_p7), %v3018_v34  ;;  %2087 = vmatpush1.bf16.msra.mxu1 (!%p2573_p7), %v3019_v35  ;;  %v3034_v45 = vld [vmem:[%s3906_s26 + $0x18c] ss:$48 sps:$4 sm:$0xff] (!%p2573_p7)   ;;  %v3036_v46 = vld [vmem:[%s3906_s26 + $0x180] ss:$48 sps:$4 sm:$0xff] (!%p2573_p7)   ;;  %v3037_v47 = vld [vmem:[%s3906_s26 + $0x188] ss:$48 sps:$4 sm:$0xff] (!%p2573_p7)  }
 0x1ea   : > { %2045 = vmatprep.subr.bf16.mxu0 (!%p2573_p7), %v3020_v36  ;;  %2088 = vmatprep.subr.bf16.mxu1 (!%p2573_p7), %v3022_v37  ;;  %v3038_v48 = vld [vmem:[%s3906_s26 + $0x1e4] ss:$48 sps:$4 sm:$0xff] (!%p2573_p7)   ;;  %v3040_v49 = vld [vmem:[%s3906_s26 + $0x1ec] ss:$48 sps:$4 sm:$0xff] (!%p2573_p7)   ;;  %v3042_v50 = vld [vmem:[%s3906_s26 + $0x1e0] ss:$48 sps:$4 sm:$0xff] (!%p2573_p7)  }
 0x1eb   : > { %v3043_v51 = vld [vmem:[%s3906_s26 + $0x1e8] ss:$48 sps:$4 sm:$0xff]   ;;  %v3044_v52 = vld [vmem:[%s3906_s26 + $0x244] ss:$48 sps:$4 sm:$0xff]   ;;  %v3046_v53 = vld [vmem:[%s3906_s26 + $0x24c] ss:$48 sps:$4 sm:$0xff]  }
 0x1ec   : > { %v3048_v54 = vld [vmem:[%s3906_s26 + $0x240] ss:$48 sps:$4 sm:$0xff]   ;;  %v3049_v55 = vld [vmem:[%s3906_s26 + $0x248] ss:$48 sps:$4 sm:$0xff]   ;;  %v3050_v56 = vld [vmem:[%s3906_s26 + $0x2a4] ss:$48 sps:$4 sm:$0xff]  }
 0x1ed   : > { %2046 = vmatpush1.bf16.msra.mxu0 %v3024_v38  ;;  %2089 = vmatpush1.bf16.msra.mxu1 %v3025_v39  ;;  %v3052_v57 = vld [vmem:[%s3906_s26 + $0x2ac] ss:$48 sps:$4 sm:$0xff]   ;;  %v3054_v58 = vld [vmem:[%s3906_s26 + $0x2a0] ss:$48 sps:$4 sm:$0xff]   ;;  %v3055_v59 = vld [vmem:[%s3906_s26 + $0x2a8] ss:$48 sps:$4 sm:$0xff]  }
 0x1ee   : > { %2047 = vmatprep.subr.bf16.mxu0 %v3026_v40  ;;  %2090 = vmatprep.subr.bf16.mxu1 %v3028_v41  ;;  %v3056_v60 = vld [vmem:[%s3906_s26 + $0x304] ss:$48 sps:$4 sm:$0xff]   ;;  %v3058_v61 = vld [vmem:[%s3906_s26 + $0x30c] ss:$48 sps:$4 sm:$0xff]   ;;  %v3060_v62 = vld [vmem:[%s3906_s26 + $0x300] ss:$48 sps:$4 sm:$0xff]  }
 0x1ef   : > { %v3061_v63 = vld [vmem:[%s3906_s26 + $0x308] ss:$48 sps:$4 sm:$0xff]   ;;  %v3062_v0 = vld [vmem:[%s3906_s26 + $0x364] ss:$48 sps:$4 sm:$0xff]   ;;  %v3064_v2 = vld [vmem:[%s3906_s26 + $0x36c] ss:$48 sps:$4 sm:$0xff]  }
 0x1f0   : > { %v3066_v3 = vld [vmem:[%s3906_s26 + $0x360] ss:$48 sps:$4 sm:$0xff]   ;;  %v3067_v4 = vld [vmem:[%s3906_s26 + $0x368] ss:$48 sps:$4 sm:$0xff]   ;;  %v3068_v5 = vld [vmem:[%s3906_s26 + $0x3c4] ss:$48 sps:$4 sm:$0xff]  }
 0x1f1   : > { %2048 = vmatpush1.bf16.msra.mxu0 %v3030_v42  ;;  %2091 = vmatpush1.bf16.msra.mxu1 %v3031_v43  ;;  %v862_v6 = vshrl.u32 %v861_v1, 7  ;;  %v3070_v7 = vld [vmem:[%s3906_s26 + $0x3cc] ss:$48 sps:$4 sm:$0xff]   ;;  %v3072_v8 = vld [vmem:[%s3906_s26 + $0x3c0] ss:$48 sps:$4 sm:$0xff]   ;;  %v856_v14 = vld [vmem:[#allocation2 + $0x8] sm:$0xff] }
 0x1f2   : > { %2049 = vmatprep.subr.bf16.mxu0 %v3032_v44  ;;  %2092 = vmatprep.subr.bf16.mxu1 %v3034_v45  ;;  %v3073_v9 = vld [vmem:[%s3906_s26 + $0x3c8] ss:$48 sps:$4 sm:$0xff]   ;;  %v3074_v10 = vld [vmem:[%s3906_s26 + $0x424] ss:$48 sps:$4 sm:$0xff]   ;;  %v3076_v12 = vld [vmem:[%s3906_s26 + $0x42c] ss:$48 sps:$4 sm:$0xff]  }
 0x1f3   : > { %v867_v11 = vsub.s32 1, %v862_v6  ;;  %v3078_v13 = vld [vmem:[%s3906_s26 + $0x420] ss:$48 sps:$4 sm:$0xff]   ;;  %v858_v15 = vld [vmem:[#allocation2 + $0x18] sm:$0xff]  ;;  %v859_v16 = vld [vmem:[%s3898_s7] sm:$0x3] }
 0x1f4   : > { %v863_v17 = vsub.s32 0, %v862_v6  ;;  %v3079_v18 = vld [vmem:[%s3906_s26 + $0x428] ss:$48 sps:$4 sm:$0xff]   ;;  %v3080_v20 = vld [vmem:[%s3906_s26 + $0x484] ss:$48 sps:$4 sm:$0xff]   ;;  %v855_v31 = vld [vmem:[#allocation2] sm:$0xff] }
 0x1f5   : > { %2050 = vmatpush1.bf16.msra.mxu0 %v3036_v46  ;;  %2093 = vmatpush1.bf16.msra.mxu1 %v3037_v47  ;;  %v868_v19 = vrot.slane %v859_v16, %v867_v11  ;;  %v3082_v21 = vld [vmem:[%s3906_s26 + $0x48c] ss:$48 sps:$4 sm:$0xff]   ;;  %v3084_v22 = vld [vmem:[%s3906_s26 + $0x480] ss:$48 sps:$4 sm:$0xff]   ;;  %v3085_v23 = vld [vmem:[%s3906_s26 + $0x488] ss:$48 sps:$4 sm:$0xff]  }
 0x1f6   : > { %2051 = vmatprep.subr.bf16.mxu0 %v3038_v48  ;;  %2094 = vmatprep.subr.bf16.mxu1 %v3040_v49  ;;  %v3086_v26 = vld [vmem:[%s3906_s26 + $0x4e4] ss:$48 sps:$4 sm:$0xff]   ;;  %v864_v27 = vrot.slane %v859_v16, %v863_v17  ;;  %v3088_v30 = vld [vmem:[%s3906_s26 + $0x4ec] ss:$48 sps:$4 sm:$0xff]   ;;  %v3090_v35 = vld [vmem:[%s3906_s26 + $0x4e0] ss:$48 sps:$4 sm:$0xff]  }
 0x1f7   : > { %v872_v24 = vadd.f32 %v868_v19, %v856_v14  ;;  %v874_v25 = vadd.f32 %v868_v19, %v858_v15  ;;  %v857_v32 = vld [vmem:[#allocation2 + $0x10] sm:$0xff]  ;;  %v3091_v37 = vld [vmem:[%s3906_s26 + $0x4e8] ss:$48 sps:$4 sm:$0xff]   ;;  %v3092_v38 = vld [vmem:[%s3906_s26 + $0x544] ss:$48 sps:$4 sm:$0xff]  }
 0x1f8   : > { %v871_v39 = vadd.f32 %v864_v27, %v855_v31  ;;  %v873_v40 = vadd.f32 %v864_v27, %v857_v32  ;;  %v3094_v41 = vld [vmem:[%s3906_s26 + $0x54c] ss:$48 sps:$4 sm:$0xff]   ;;  %v3096_v42 = vld [vmem:[%s3906_s26 + $0x540] ss:$48 sps:$4 sm:$0xff]   ;;  %v3097_v43 = vld [vmem:[%s3906_s26 + $0x548] ss:$48 sps:$4 sm:$0xff]  }
 0x1f9   : > { %2052 = vmatpush1.bf16.msra.mxu0 %v3042_v50  ;;  %2095 = vmatpush1.bf16.msra.mxu1 %v3043_v51  ;;  %vm876_vm0 = vcmp.ge.f32.partialorder %v872_v24, 0.0  ;;  %vm878_vm1 = vcmp.ge.f32.partialorder %v874_v25, 0.0  ;;  %v880_v28 = vmul.f32 0.1, %v872_v24  ;;  %v882_v29 = vmul.f32 0.1, %v874_v25 }
 0x1fa   : > { %2053 = vmatprep.subr.bf16.mxu0 %v3044_v52  ;;  %2096 = vmatprep.subr.bf16.mxu1 %v3046_v53  ;;  %v3098_v44 = vld [vmem:[%s3906_s26 + $0x5a4] ss:$48 sps:$4 sm:$0xff]   ;;  %v879_v45 = vmul.f32 0.1, %v871_v39  ;;  %v881_v46 = vmul.f32 0.1, %v873_v40 }
 0x1fb   : > { %v884_v33 = vsel %vm876_vm0, %v872_v24, %v880_v28  ;;  %v886_v34 = vsel %vm878_vm1, %v874_v25, %v882_v29  ;;  %v3100_v47 = vld [vmem:[%s3906_s26 + $0x5ac] ss:$48 sps:$4 sm:$0xff]   ;;  %vm875_vm2 = vcmp.ge.f32.partialorder %v871_v39, 0.0  ;;  %vm877_vm3 = vcmp.ge.f32.partialorder %v873_v40, 0.0  ;;  %v3102_v48 = vld [vmem:[%s3906_s26 + $0x5a0] ss:$48 sps:$4 sm:$0xff]  }
 0x1fc   : > { %v4041_v36 = vpack.c.bf16 %v886_v34, %v884_v33  ;;  %v3103_v49 = vld [vmem:[%s3906_s26 + $0x5a8] ss:$48 sps:$4 sm:$0xff]   ;;  %v883_v50 = vsel %vm875_vm2, %v871_v39, %v879_v45  ;;  %v885_v51 = vsel %vm877_vm3, %v873_v40, %v881_v46  ;;  %v3106_v52 = vld [vmem:[%s3906_s26 + $0x14] ss:$48 sps:$4 sm:$0xff]   ;;  %v3109_v53 = vld [vmem:[%s3906_s26 + $0x1c] ss:$48 sps:$4 sm:$0xff]  }
 0x1fd   : > { %2054 = vmatpush1.bf16.msra.mxu0 %v3048_v54  ;;  %2097 = vmatpush1.bf16.msra.mxu1 %v3049_v55  ;;  %v4056_v54 = vpack.c.bf16 %v885_v51, %v883_v50  ;;  %v3104_v55 = vld [vmem:[%s3906_s26 + $0x10] ss:$48 sps:$4 sm:$0xff]   ;;  %v3124_v1 = vld [vmem:[%s3906_s26 + $0x134] ss:$48 sps:$4 sm:$0xff]   ;;  %v3133_v6 = vld [vmem:[%s3906_s26 + $0x19c] ss:$48 sps:$4 sm:$0xff]  }
 0x1fe   : > { %2055 = vmatprep.subr.bf16.mxu0 %v3050_v56  ;;  %2098 = vmatprep.subr.bf16.mxu1 %v3052_v57  ;;  %v3107_v56 = vld [vmem:[%s3906_s26 + $0x18] ss:$48 sps:$4 sm:$0xff]   ;;  %v3112_v57 = vld [vmem:[%s3906_s26 + $0x74] ss:$48 sps:$4 sm:$0xff]   ;;  %v3134_v11 = vld [vmem:[%s3906_s26 + $0x1f0] ss:$48 sps:$4 sm:$0xff]  }
 0x1ff   : > { %2073 = vmatprep.mubr.bf16.mxu0 %v4041_v36  ;;  %2116 = vmatprep.mubr.bf16.mxu1 %v4041_v36  ;;  %v3145_v14 = vld [vmem:[%s3906_s26 + $0x25c] ss:$48 sps:$4 sm:$0xff]   ;;  %v3140_v15 = vld [vmem:[%s3906_s26 + $0x250] ss:$48 sps:$4 sm:$0xff]   ;;  %v3143_v16 = vld [vmem:[%s3906_s26 + $0x258] ss:$48 sps:$4 sm:$0xff]  }
 0x200   : > { %v3148_v17 = vld [vmem:[%s3906_s26 + $0x2b4] ss:$48 sps:$4 sm:$0xff]   ;;  %v3146_v19 = vld [vmem:[%s3906_s26 + $0x2b0] ss:$48 sps:$4 sm:$0xff]   ;;  %v3155_v24 = vld [vmem:[%s3906_s26 + $0x318] ss:$48 sps:$4 sm:$0xff]  }
 0x201   : > { %2056 = vmatpush1.bf16.msra.mxu0 %v3054_v58  ;;  %2099 = vmatpush1.bf16.msra.mxu1 %v3055_v59  ;;  %v3115_v58 = vld [vmem:[%s3906_s26 + $0x7c] ss:$48 sps:$4 sm:$0xff]   ;;  %v3110_v59 = vld [vmem:[%s3906_s26 + $0x70] ss:$48 sps:$4 sm:$0xff]   ;;  %v3160_v25 = vld [vmem:[%s3906_s26 + $0x374] ss:$48 sps:$4 sm:$0xff]  }
 0x202   : > { %2057 = vmatprep.subr.bf16.mxu0 %v3056_v60  ;;  %2100 = vmatprep.subr.bf16.mxu1 %v3058_v61  ;;  %v3113_v60 = vld [vmem:[%s3906_s26 + $0x78] ss:$48 sps:$4 sm:$0xff]   ;;  %v3118_v61 = vld [vmem:[%s3906_s26 + $0xd4] ss:$48 sps:$4 sm:$0xff]   ;;  %v3158_v27 = vld [vmem:[%s3906_s26 + $0x370] ss:$48 sps:$4 sm:$0xff]  }
 0x203   : > { %v3161_v28 = vld [vmem:[%s3906_s26 + $0x378] ss:$48 sps:$4 sm:$0xff]   ;;  %v3166_v29 = vld [vmem:[%s3906_s26 + $0x3d4] ss:$48 sps:$4 sm:$0xff]   ;;  %v3164_v31 = vld [vmem:[%s3906_s26 + $0x3d0] ss:$48 sps:$4 sm:$0xff]  }
 0x204   : > { %v3167_v32 = vld [vmem:[%s3906_s26 + $0x3d8] ss:$48 sps:$4 sm:$0xff]   ;;  %v3172_v33 = vld [vmem:[%s3906_s26 + $0x434] ss:$48 sps:$4 sm:$0xff]   ;;  %v3175_v34 = vld [vmem:[%s3906_s26 + $0x43c] ss:$48 sps:$4 sm:$0xff]  }
 0x205   : > { %2058 = vmatpush1.bf16.msra.mxu0 %v3060_v62  ;;  %2101 = vmatpush1.bf16.msra.mxu1 %v3061_v63  ;;  %v3121_v62 = vld [vmem:[%s3906_s26 + $0xdc] ss:$48 sps:$4 sm:$0xff]   ;;  %v3116_v63 = vld [vmem:[%s3906_s26 + $0xd0] ss:$48 sps:$4 sm:$0xff]   ;;  %v3185_v45 = vld [vmem:[%s3906_s26 + $0x4f8] ss:$48 sps:$4 sm:$0xff]  }
 0x206   : > { %2059 = vmatprep.subr.bf16.mxu0 %v3062_v0  ;;  %2102 = vmatprep.subr.bf16.mxu1 %v3064_v2  ;;  %v3119_v0 = vld [vmem:[%s3906_s26 + $0xd8] ss:$48 sps:$4 sm:$0xff]   ;;  %v3127_v2 = vld [vmem:[%s3906_s26 + $0x13c] ss:$48 sps:$4 sm:$0xff]   ;;  %v3176_v40 = vld [vmem:[%s3906_s26 + $0x490] ss:$48 sps:$4 sm:$0xff]  }
 0x207   : > { %v3181_v39 = vld [vmem:[%s3906_s26 + $0x49c] ss:$48 sps:$4 sm:$0xff]   ;;  %v3190_v46 = vld [vmem:[%s3906_s26 + $0x554] ss:$48 sps:$4 sm:$0xff]  }
 0x208   : > { %v3196_v50 = vld [vmem:[%s3906_s26 + $0x5b4] ss:$48 sps:$4 sm:$0xff]   ;;  %v3199_v51 = vld [vmem:[%s3906_s26 + $0x5bc] ss:$48 sps:$4 sm:$0xff]  }
 0x209   : > { %2060 = vmatpush1.bf16.msra.mxu0 %v3066_v3  ;;  %2103 = vmatpush1.bf16.msra.mxu1 %v3067_v4  ;;  %v3122_v3 = vld [vmem:[%s3906_s26 + $0x130] ss:$48 sps:$4 sm:$0xff]   ;;  %v3125_v4 = vld [vmem:[%s3906_s26 + $0x138] ss:$48 sps:$4 sm:$0xff]  }
 0x20a   : > { %2061 = vmatprep.subr.bf16.mxu0 %v3068_v5  ;;  %2104 = vmatprep.subr.bf16.mxu1 %v3070_v7  ;;  %v3130_v5 = vld [vmem:[%s3906_s26 + $0x194] ss:$48 sps:$4 sm:$0xff]   ;;  %v3128_v7 = vld [vmem:[%s3906_s26 + $0x190] ss:$48 sps:$4 sm:$0xff]  }
 0x20d   : > { %2062 = vmatpush1.bf16.msra.mxu0 %v3072_v8  ;;  %2105 = vmatpush1.bf16.msra.mxu1 %v3073_v9  ;;  %v3131_v8 = vld [vmem:[%s3906_s26 + $0x198] ss:$48 sps:$4 sm:$0xff]   ;;  %v3136_v9 = vld [vmem:[%s3906_s26 + $0x1f4] ss:$48 sps:$4 sm:$0xff]  }
 0x20e   : > { %2063 = vmatprep.subr.bf16.mxu0 %v3074_v10  ;;  %2106 = vmatprep.subr.bf16.mxu1 %v3076_v12  ;;  %v3139_v10 = vld [vmem:[%s3906_s26 + $0x1fc] ss:$48 sps:$4 sm:$0xff]   ;;  %v3137_v12 = vld [vmem:[%s3906_s26 + $0x1f8] ss:$48 sps:$4 sm:$0xff]  }
 0x211   : > { %2064 = vmatpush1.bf16.msra.mxu0 %v3078_v13  ;;  %2107 = vmatpush1.bf16.msra.mxu1 %v3079_v18  ;;  %v3142_v13 = vld [vmem:[%s3906_s26 + $0x254] ss:$48 sps:$4 sm:$0xff]   ;;  %v3151_v18 = vld [vmem:[%s3906_s26 + $0x2bc] ss:$48 sps:$4 sm:$0xff]  }
 0x212   : > { %2065 = vmatprep.subr.bf16.mxu0 %v3080_v20  ;;  %2108 = vmatprep.subr.bf16.mxu1 %v3082_v21  ;;  %v3149_v20 = vld [vmem:[%s3906_s26 + $0x2b8] ss:$48 sps:$4 sm:$0xff]   ;;  %v3154_v21 = vld [vmem:[%s3906_s26 + $0x314] ss:$48 sps:$4 sm:$0xff]  }
 0x215   : > { %2066 = vmatpush1.bf16.msra.mxu0 %v3084_v22  ;;  %2109 = vmatpush1.bf16.msra.mxu1 %v3085_v23  ;;  %v3157_v22 = vld [vmem:[%s3906_s26 + $0x31c] ss:$48 sps:$4 sm:$0xff]   ;;  %v3152_v23 = vld [vmem:[%s3906_s26 + $0x310] ss:$48 sps:$4 sm:$0xff]  }
 0x216   : > { %2067 = vmatprep.subr.bf16.mxu0 %v3086_v26  ;;  %2110 = vmatprep.subr.bf16.mxu1 %v3088_v30  ;;  %v3163_v26 = vld [vmem:[%s3906_s26 + $0x37c] ss:$48 sps:$4 sm:$0xff]  }
 0x217   : > { %v3169_v30 = vld [vmem:[%s3906_s26 + $0x3dc] ss:$48 sps:$4 sm:$0xff]  }
 0x219   : > { %2068 = vmatpush1.bf16.msra.mxu0 %v3090_v35  ;;  %2111 = vmatpush1.bf16.msra.mxu1 %v3091_v37  ;;  %v3170_v35 = vld [vmem:[%s3906_s26 + $0x430] ss:$48 sps:$4 sm:$0xff]   ;;  %v3173_v37 = vld [vmem:[%s3906_s26 + $0x438] ss:$48 sps:$4 sm:$0xff]  }
 0x21a   : > { %2069 = vmatprep.subr.bf16.mxu0 %v3092_v38  ;;  %2112 = vmatprep.subr.bf16.mxu1 %v3094_v41  ;;  %v3178_v38 = vld [vmem:[%s3906_s26 + $0x494] ss:$48 sps:$4 sm:$0xff]   ;;  %v3179_v41 = vld [vmem:[%s3906_s26 + $0x498] ss:$48 sps:$4 sm:$0xff]  }
 0x21d   : > { %2070 = vmatpush1.bf16.msra.mxu0 %v3096_v42  ;;  %2113 = vmatpush1.bf16.msra.mxu1 %v3097_v43  ;;  %v3184_v42 = vld [vmem:[%s3906_s26 + $0x4f4] ss:$48 sps:$4 sm:$0xff]   ;;  %v3187_v43 = vld [vmem:[%s3906_s26 + $0x4fc] ss:$48 sps:$4 sm:$0xff]  }
 0x21e   : > { %2071 = vmatprep.subr.bf16.mxu0 %v3098_v44  ;;  %2114 = vmatprep.subr.bf16.mxu1 %v3100_v47  ;;  %v3182_v44 = vld [vmem:[%s3906_s26 + $0x4f0] ss:$48 sps:$4 sm:$0xff]   ;;  %v3193_v47 = vld [vmem:[%s3906_s26 + $0x55c] ss:$48 sps:$4 sm:$0xff]  }
 0x221   : > { %2072 = vmatpush1.bf16.msra.mxu0 %v3102_v48  ;;  %2115 = vmatpush1.bf16.msra.mxu1 %v3103_v49  ;;  %v3188_v48 = vld [vmem:[%s3906_s26 + $0x550] ss:$48 sps:$4 sm:$0xff]   ;;  %v3191_v49 = vld [vmem:[%s3906_s26 + $0x558] ss:$48 sps:$4 sm:$0xff]  }
 0x222   : > { %2127 = vmatprep.subr.bf16.mxu0 %v3106_v52  ;;  %2170 = vmatprep.subr.bf16.mxu1 %v3109_v53  ;;  %v3194_v52 = vld [vmem:[%s3906_s26 + $0x5b0] ss:$48 sps:$4 sm:$0xff]   ;;  %v3197_v53 = vld [vmem:[%s3906_s26 + $0x5b8] ss:$48 sps:$4 sm:$0xff]  }
 0x224   : > { %2074 = vmatmul.mubr.bf16.vlgmr.msra.gmra.mrb[0].mxu0 %v4056_v54  ;;  %2117 = vmatmul.mubr.bf16.vlgmr.msra.gmra.mrb[0].mxu1 %v4056_v54 }
 0x225   : > { %2128 = vmatpush1.bf16.msra.mxu0 %v3104_v55  ;;  %2171 = vmatpush1.bf16.msra.mxu1 %v3107_v56  ;;  %v3202_v55 = vld [vmem:[%s3906_s26 + $0x24] ss:$48 sps:$4 sm:$0xff]   ;;  %v3205_v56 = vld [vmem:[%s3906_s26 + $0x2c] ss:$48 sps:$4 sm:$0xff]  }
 0x226   : > { %2129 = vmatprep.subr.bf16.mxu0 %v3112_v57  ;;  %2172 = vmatprep.subr.bf16.mxu1 %v3115_v58  ;;  %v3200_v57 = vld [vmem:[%s3906_s26 + $0x20] ss:$48 sps:$4 sm:$0xff]   ;;  %v3203_v58 = vld [vmem:[%s3906_s26 + $0x28] ss:$48 sps:$4 sm:$0xff]  }
 0x227   : > { %2159 = vmatprep.mubr.bf16.mxu0 %v4041_v36  ;;  %2202 = vmatprep.mubr.bf16.mxu1 %v4041_v36 }
 0x229   : > { %2130 = vmatpush1.bf16.msra.mxu0 %v3110_v59  ;;  %2173 = vmatpush1.bf16.msra.mxu1 %v3113_v60  ;;  %v3208_v59 = vld [vmem:[%s3906_s26 + $0x84] ss:$48 sps:$4 sm:$0xff]   ;;  %v3211_v60 = vld [vmem:[%s3906_s26 + $0x8c] ss:$48 sps:$4 sm:$0xff]  }
 0x22a   : > { %2131 = vmatprep.subr.bf16.mxu0 %v3118_v61  ;;  %2174 = vmatprep.subr.bf16.mxu1 %v3121_v62  ;;  %v3206_v61 = vld [vmem:[%s3906_s26 + $0x80] ss:$48 sps:$4 sm:$0xff]   ;;  %v3209_v62 = vld [vmem:[%s3906_s26 + $0x88] ss:$48 sps:$4 sm:$0xff]  }
 0x22d   : > { %2132 = vmatpush1.bf16.msra.mxu0 %v3116_v63  ;;  %2175 = vmatpush1.bf16.msra.mxu1 %v3119_v0  ;;  %v3214_v63 = vld [vmem:[%s3906_s26 + $0xe4] ss:$48 sps:$4 sm:$0xff]   ;;  %v3217_v0 = vld [vmem:[%s3906_s26 + $0xec] ss:$48 sps:$4 sm:$0xff]  }
 0x22e   : > { %2133 = vmatprep.subr.bf16.mxu0 %v3124_v1  ;;  %2176 = vmatprep.subr.bf16.mxu1 %v3127_v2  ;;  %v3212_v1 = vld [vmem:[%s3906_s26 + $0xe0] ss:$48 sps:$4 sm:$0xff]   ;;  %v3215_v2 = vld [vmem:[%s3906_s26 + $0xe8] ss:$48 sps:$4 sm:$0xff]  }
 0x231   : > { %2134 = vmatpush1.bf16.msra.mxu0 %v3122_v3  ;;  %2177 = vmatpush1.bf16.msra.mxu1 %v3125_v4  ;;  %v3220_v3 = vld [vmem:[%s3906_s26 + $0x144] ss:$48 sps:$4 sm:$0xff]   ;;  %v3223_v4 = vld [vmem:[%s3906_s26 + $0x14c] ss:$48 sps:$4 sm:$0xff]  }
 0x232   : > { %2135 = vmatprep.subr.bf16.mxu0 %v3130_v5  ;;  %2178 = vmatprep.subr.bf16.mxu1 %v3133_v6  ;;  %v3218_v5 = vld [vmem:[%s3906_s26 + $0x140] ss:$48 sps:$4 sm:$0xff]   ;;  %v3221_v6 = vld [vmem:[%s3906_s26 + $0x148] ss:$48 sps:$4 sm:$0xff]  }
 0x235   : > { %2136 = vmatpush1.bf16.msra.mxu0 %v3128_v7  ;;  %2179 = vmatpush1.bf16.msra.mxu1 %v3131_v8  ;;  %v3229_v7 = vld [vmem:[%s3906_s26 + $0x1ac] ss:$48 sps:$4 sm:$0xff]   ;;  %v3224_v8 = vld [vmem:[%s3906_s26 + $0x1a0] ss:$48 sps:$4 sm:$0xff]  }
 0x236   : > { %2137 = vmatprep.subr.bf16.mxu0 %v3136_v9  ;;  %2180 = vmatprep.subr.bf16.mxu1 %v3139_v10  ;;  %v3227_v9 = vld [vmem:[%s3906_s26 + $0x1a8] ss:$48 sps:$4 sm:$0xff]   ;;  %v3232_v10 = vld [vmem:[%s3906_s26 + $0x204] ss:$48 sps:$4 sm:$0xff]  }
 0x239   : > { %2138 = vmatpush1.bf16.msra.mxu0 %v3134_v11  ;;  %2181 = vmatpush1.bf16.msra.mxu1 %v3137_v12  ;;  %v3235_v11 = vld [vmem:[%s3906_s26 + $0x20c] ss:$48 sps:$4 sm:$0xff]   ;;  %v3230_v12 = vld [vmem:[%s3906_s26 + $0x200] ss:$48 sps:$4 sm:$0xff]  }
 0x23a   : > { %2139 = vmatprep.subr.bf16.mxu0 %v3142_v13  ;;  %2182 = vmatprep.subr.bf16.mxu1 %v3145_v14  ;;  %v3233_v13 = vld [vmem:[%s3906_s26 + $0x208] ss:$48 sps:$4 sm:$0xff]   ;;  %v3238_v14 = vld [vmem:[%s3906_s26 + $0x264] ss:$48 sps:$4 sm:$0xff]  }
 0x23d   : > { %2140 = vmatpush1.bf16.msra.mxu0 %v3140_v15  ;;  %2183 = vmatpush1.bf16.msra.mxu1 %v3143_v16  ;;  %v3241_v15 = vld [vmem:[%s3906_s26 + $0x26c] ss:$48 sps:$4 sm:$0xff]   ;;  %v3236_v16 = vld [vmem:[%s3906_s26 + $0x260] ss:$48 sps:$4 sm:$0xff]  }
 0x23e   : > { %2141 = vmatprep.subr.bf16.mxu0 %v3148_v17  ;;  %2184 = vmatprep.subr.bf16.mxu1 %v3151_v18  ;;  %v3239_v17 = vld [vmem:[%s3906_s26 + $0x268] ss:$48 sps:$4 sm:$0xff]   ;;  %v3244_v18 = vld [vmem:[%s3906_s26 + $0x2c4] ss:$48 sps:$4 sm:$0xff]  }
 0x241   : > { %2142 = vmatpush1.bf16.msra.mxu0 %v3146_v19  ;;  %2185 = vmatpush1.bf16.msra.mxu1 %v3149_v20  ;;  %v3247_v19 = vld [vmem:[%s3906_s26 + $0x2cc] ss:$48 sps:$4 sm:$0xff]   ;;  %v3242_v20 = vld [vmem:[%s3906_s26 + $0x2c0] ss:$48 sps:$4 sm:$0xff]  }
 0x242   : > { %2143 = vmatprep.subr.bf16.mxu0 %v3154_v21  ;;  %2186 = vmatprep.subr.bf16.mxu1 %v3157_v22  ;;  %v3245_v21 = vld [vmem:[%s3906_s26 + $0x2c8] ss:$48 sps:$4 sm:$0xff]   ;;  %v3250_v22 = vld [vmem:[%s3906_s26 + $0x324] ss:$48 sps:$4 sm:$0xff]  }
 0x245   : > { %2144 = vmatpush1.bf16.msra.mxu0 %v3152_v23  ;;  %2187 = vmatpush1.bf16.msra.mxu1 %v3155_v24  ;;  %v3253_v23 = vld [vmem:[%s3906_s26 + $0x32c] ss:$48 sps:$4 sm:$0xff]   ;;  %v3248_v24 = vld [vmem:[%s3906_s26 + $0x320] ss:$48 sps:$4 sm:$0xff]  }
 0x246   : > { %2145 = vmatprep.subr.bf16.mxu0 %v3160_v25  ;;  %2188 = vmatprep.subr.bf16.mxu1 %v3163_v26  ;;  %v3251_v25 = vld [vmem:[%s3906_s26 + $0x328] ss:$48 sps:$4 sm:$0xff]   ;;  %v3256_v26 = vld [vmem:[%s3906_s26 + $0x384] ss:$48 sps:$4 sm:$0xff]  }
 0x249   : > { %2146 = vmatpush1.bf16.msra.mxu0 %v3158_v27  ;;  %2189 = vmatpush1.bf16.msra.mxu1 %v3161_v28  ;;  %v3259_v27 = vld [vmem:[%s3906_s26 + $0x38c] ss:$48 sps:$4 sm:$0xff]   ;;  %v3254_v28 = vld [vmem:[%s3906_s26 + $0x380] ss:$48 sps:$4 sm:$0xff]  }
 0x24a   : > { %2147 = vmatprep.subr.bf16.mxu0 %v3166_v29  ;;  %2190 = vmatprep.subr.bf16.mxu1 %v3169_v30  ;;  %v3257_v29 = vld [vmem:[%s3906_s26 + $0x388] ss:$48 sps:$4 sm:$0xff]   ;;  %v3262_v30 = vld [vmem:[%s3906_s26 + $0x3e4] ss:$48 sps:$4 sm:$0xff]  }
 0x24d   : > { %2148 = vmatpush1.bf16.msra.mxu0 %v3164_v31  ;;  %2191 = vmatpush1.bf16.msra.mxu1 %v3167_v32  ;;  %v3265_v31 = vld [vmem:[%s3906_s26 + $0x3ec] ss:$48 sps:$4 sm:$0xff]   ;;  %v3260_v32 = vld [vmem:[%s3906_s26 + $0x3e0] ss:$48 sps:$4 sm:$0xff]  }
 0x24e   : > { %2149 = vmatprep.subr.bf16.mxu0 %v3172_v33  ;;  %2192 = vmatprep.subr.bf16.mxu1 %v3175_v34  ;;  %v3263_v33 = vld [vmem:[%s3906_s26 + $0x3e8] ss:$48 sps:$4 sm:$0xff]   ;;  %v3268_v34 = vld [vmem:[%s3906_s26 + $0x444] ss:$48 sps:$4 sm:$0xff]  }
 0x251   : > { %2150 = vmatpush1.bf16.msra.mxu0 %v3170_v35  ;;  %2193 = vmatpush1.bf16.msra.mxu1 %v3173_v37  ;;  %v3271_v35 = vld [vmem:[%s3906_s26 + $0x44c] ss:$48 sps:$4 sm:$0xff]   ;;  %v3266_v37 = vld [vmem:[%s3906_s26 + $0x440] ss:$48 sps:$4 sm:$0xff]  }
 0x252   : > { %2151 = vmatprep.subr.bf16.mxu0 %v3178_v38  ;;  %2194 = vmatprep.subr.bf16.mxu1 %v3181_v39  ;;  %v3269_v38 = vld [vmem:[%s3906_s26 + $0x448] ss:$48 sps:$4 sm:$0xff]   ;;  %v3274_v39 = vld [vmem:[%s3906_s26 + $0x4a4] ss:$48 sps:$4 sm:$0xff]  }
 0x255   : > { %2152 = vmatpush1.bf16.msra.mxu0 %v3176_v40  ;;  %2195 = vmatpush1.bf16.msra.mxu1 %v3179_v41  ;;  %v3277_v40 = vld [vmem:[%s3906_s26 + $0x4ac] ss:$48 sps:$4 sm:$0xff]   ;;  %v3272_v41 = vld [vmem:[%s3906_s26 + $0x4a0] ss:$48 sps:$4 sm:$0xff]  }
 0x256   : > { %2153 = vmatprep.subr.bf16.mxu0 %v3184_v42  ;;  %2196 = vmatprep.subr.bf16.mxu1 %v3187_v43  ;;  %v3275_v42 = vld [vmem:[%s3906_s26 + $0x4a8] ss:$48 sps:$4 sm:$0xff]   ;;  %v3280_v43 = vld [vmem:[%s3906_s26 + $0x504] ss:$48 sps:$4 sm:$0xff]  }
 0x259   : > { %2154 = vmatpush1.bf16.msra.mxu0 %v3182_v44  ;;  %2197 = vmatpush1.bf16.msra.mxu1 %v3185_v45  ;;  %v3283_v44 = vld [vmem:[%s3906_s26 + $0x50c] ss:$48 sps:$4 sm:$0xff]   ;;  %v3278_v45 = vld [vmem:[%s3906_s26 + $0x500] ss:$48 sps:$4 sm:$0xff]  }
 0x25a   : > { %2155 = vmatprep.subr.bf16.mxu0 %v3190_v46  ;;  %2198 = vmatprep.subr.bf16.mxu1 %v3193_v47  ;;  %v3281_v46 = vld [vmem:[%s3906_s26 + $0x508] ss:$48 sps:$4 sm:$0xff]   ;;  %v3286_v47 = vld [vmem:[%s3906_s26 + $0x564] ss:$48 sps:$4 sm:$0xff]  }
 0x25d   : > { %2156 = vmatpush1.bf16.msra.mxu0 %v3188_v48  ;;  %2199 = vmatpush1.bf16.msra.mxu1 %v3191_v49  ;;  %v3289_v48 = vld [vmem:[%s3906_s26 + $0x56c] ss:$48 sps:$4 sm:$0xff]   ;;  %v3284_v49 = vld [vmem:[%s3906_s26 + $0x560] ss:$48 sps:$4 sm:$0xff]  }
 0x25e   : > { %2157 = vmatprep.subr.bf16.mxu0 %v3196_v50  ;;  %2200 = vmatprep.subr.bf16.mxu1 %v3199_v51  ;;  %v3287_v50 = vld [vmem:[%s3906_s26 + $0x568] ss:$48 sps:$4 sm:$0xff]   ;;  %v3292_v51 = vld [vmem:[%s3906_s26 + $0x5c4] ss:$48 sps:$4 sm:$0xff]  }
 0x261   : > { %2158 = vmatpush1.bf16.msra.mxu0 %v3194_v52  ;;  %2201 = vmatpush1.bf16.msra.mxu1 %v3197_v53  ;;  %v3295_v52 = vld [vmem:[%s3906_s26 + $0x5cc] ss:$48 sps:$4 sm:$0xff]   ;;  %v3290_v53 = vld [vmem:[%s3906_s26 + $0x5c0] ss:$48 sps:$4 sm:$0xff]  }
 0x262   : > { %2213 = vmatprep.subr.bf16.mxu0 %v3202_v55  ;;  %2256 = vmatprep.subr.bf16.mxu1 %v3205_v56  ;;  %v3293_v55 = vld [vmem:[%s3906_s26 + $0x5c8] ss:$48 sps:$4 sm:$0xff]  }
 0x264   : > { %2160 = vmatmul.mubr.bf16.vlgmr.msra.gmra.mrb[4].mxu0 %v4056_v54  ;;  %2203 = vmatmul.mubr.bf16.vlgmr.msra.gmra.mrb[4].mxu1 %v4056_v54 }
 0x265   : > { %2214 = vmatpush1.bf16.msra.mxu0 %v3200_v57  ;;  %2257 = vmatpush1.bf16.msra.mxu1 %v3203_v58 }
 0x266   : > { %2215 = vmatprep.subr.bf16.mxu0 %v3208_v59  ;;  %2258 = vmatprep.subr.bf16.mxu1 %v3211_v60 }
 0x267   : > { %2245 = vmatprep.mubr.bf16.mxu0 %v4041_v36  ;;  %2288 = vmatprep.mubr.bf16.mxu1 %v4041_v36  ;;  %v3226_v36 = vld [vmem:[%s3906_s26 + $0x1a4] ss:$48 sps:$4 sm:$0xff]  }
 0x269   : > { %2216 = vmatpush1.bf16.msra.mxu0 %v3206_v61  ;;  %2259 = vmatpush1.bf16.msra.mxu1 %v3209_v62 }
 0x26a   : > { %2217 = vmatprep.subr.bf16.mxu0 %v3214_v63  ;;  %2260 = vmatprep.subr.bf16.mxu1 %v3217_v0 }
 0x26d   : > { %2218 = vmatpush1.bf16.msra.mxu0 %v3212_v1  ;;  %2261 = vmatpush1.bf16.msra.mxu1 %v3215_v2 }
 0x26e   : > { %2219 = vmatprep.subr.bf16.mxu0 %v3220_v3  ;;  %2262 = vmatprep.subr.bf16.mxu1 %v3223_v4 }
 0x271   : > { %2220 = vmatpush1.bf16.msra.mxu0 %v3218_v5  ;;  %2263 = vmatpush1.bf16.msra.mxu1 %v3221_v6 }
 0x272   : > { %2221 = vmatprep.subr.bf16.mxu0 %v3226_v36  ;;  %2264 = vmatprep.subr.bf16.mxu1 %v3229_v7 }
 0x275   : > { %2222 = vmatpush1.bf16.msra.mxu0 %v3224_v8  ;;  %2265 = vmatpush1.bf16.msra.mxu1 %v3227_v9 }
 0x276   : > { %2223 = vmatprep.subr.bf16.mxu0 %v3232_v10  ;;  %2266 = vmatprep.subr.bf16.mxu1 %v3235_v11 }
 0x279   : > { %2224 = vmatpush1.bf16.msra.mxu0 %v3230_v12  ;;  %2267 = vmatpush1.bf16.msra.mxu1 %v3233_v13 }
 0x27a   : > { %2225 = vmatprep.subr.bf16.mxu0 %v3238_v14  ;;  %2268 = vmatprep.subr.bf16.mxu1 %v3241_v15 }
 0x27d   : > { %2226 = vmatpush1.bf16.msra.mxu0 %v3236_v16  ;;  %2269 = vmatpush1.bf16.msra.mxu1 %v3239_v17 }
 0x27e   : > { %2227 = vmatprep.subr.bf16.mxu0 %v3244_v18  ;;  %2270 = vmatprep.subr.bf16.mxu1 %v3247_v19 }
 0x281   : > { %2228 = vmatpush1.bf16.msra.mxu0 %v3242_v20  ;;  %2271 = vmatpush1.bf16.msra.mxu1 %v3245_v21 }
 0x282   : > { %2229 = vmatprep.subr.bf16.mxu0 %v3250_v22  ;;  %2272 = vmatprep.subr.bf16.mxu1 %v3253_v23 }
 0x285   : > { %2230 = vmatpush1.bf16.msra.mxu0 %v3248_v24  ;;  %2273 = vmatpush1.bf16.msra.mxu1 %v3251_v25 }
 0x286   : > { %2231 = vmatprep.subr.bf16.mxu0 %v3256_v26  ;;  %2274 = vmatprep.subr.bf16.mxu1 %v3259_v27 }
 0x289   : > { %2232 = vmatpush1.bf16.msra.mxu0 %v3254_v28  ;;  %2275 = vmatpush1.bf16.msra.mxu1 %v3257_v29 }
 0x28a   : > { %2233 = vmatprep.subr.bf16.mxu0 %v3262_v30  ;;  %2276 = vmatprep.subr.bf16.mxu1 %v3265_v31 }
 0x28d   : > { %2234 = vmatpush1.bf16.msra.mxu0 %v3260_v32  ;;  %2277 = vmatpush1.bf16.msra.mxu1 %v3263_v33 }
 0x28e   : > { %2235 = vmatprep.subr.bf16.mxu0 %v3268_v34  ;;  %2278 = vmatprep.subr.bf16.mxu1 %v3271_v35 }
 0x291   : > { %2236 = vmatpush1.bf16.msra.mxu0 %v3266_v37  ;;  %2279 = vmatpush1.bf16.msra.mxu1 %v3269_v38 }
 0x292   : > { %2237 = vmatprep.subr.bf16.mxu0 %v3274_v39  ;;  %2280 = vmatprep.subr.bf16.mxu1 %v3277_v40 }
 0x295   : > { %2238 = vmatpush1.bf16.msra.mxu0 %v3272_v41  ;;  %2281 = vmatpush1.bf16.msra.mxu1 %v3275_v42 }
 0x296   : > { %2239 = vmatprep.subr.bf16.mxu0 %v3280_v43  ;;  %2282 = vmatprep.subr.bf16.mxu1 %v3283_v44 }
 0x299   : > { %2240 = vmatpush1.bf16.msra.mxu0 %v3278_v45  ;;  %2283 = vmatpush1.bf16.msra.mxu1 %v3281_v46 }
 0x29a   : > { %2241 = vmatprep.subr.bf16.mxu0 %v3286_v47  ;;  %2284 = vmatprep.subr.bf16.mxu1 %v3289_v48 }
 0x29d   : > { %2242 = vmatpush1.bf16.msra.mxu0 %v3284_v49  ;;  %2285 = vmatpush1.bf16.msra.mxu1 %v3287_v50 }
 0x29e   : > { %2243 = vmatprep.subr.bf16.mxu0 %v3292_v51  ;;  %2286 = vmatprep.subr.bf16.mxu1 %v3295_v52 }
 0x2a1   : > { %2244 = vmatpush1.bf16.msra.mxu0 %v3290_v53  ;;  %2287 = vmatpush1.bf16.msra.mxu1 %v3293_v55 }
 0x2a4   : > { %2246 = vmatmul.mubr.bf16.vlgmr.msra.gmra.mrb[8].mxu0 %v4056_v54  ;;  %2289 = vmatmul.mubr.bf16.vlgmr.msra.gmra.mrb[8].mxu1 %v4056_v54 }
 0x2f7   : > { %v2075_v56 = vpop.f32.mrb[0].mxu0  ;;  %v2118_v57 = vpop.f32.mrb[0].mxu1 }
 0x2f8   : > { %2299 = vst [vmem:[%s3980_s29] sm:$0xff] %v2075_v56  ;;  %2301 = vst [vmem:[%s3980_s29 + $0x10] sm:$0xff] %v2118_v57  ;;  %v2077_v58 = vpop.f32.mrb[1].mxu0  ;;  %v2120_v59 = vpop.f32.mrb[1].mxu1 }
 0x2f9   : > { %2300 = vst [vmem:[%s3980_s29 + $0x8] sm:$0xff] %v2077_v58  ;;  %2302 = vst [vmem:[%s3980_s29 + $0x18] sm:$0xff] %v2120_v59  ;;  %v2079_v60 = vpop.f32.mrb[2].mxu0  ;;  %v2122_v61 = vpop.f32.mrb[2].mxu1 }
 0x2fa   : > { %2311 = vst [vmem:[%s3980_s29 + $0x60] sm:$0xff] %v2079_v60  ;;  %2313 = vst [vmem:[%s3980_s29 + $0x70] sm:$0xff] %v2122_v61  ;;  %v2081_v54 = vpop.f32.mrb[3].mxu0  ;;  %v2124_v62 = vpop.f32.mrb[3].mxu1 }
 0x2fb   : > { %2312 = vst [vmem:[%s3980_s29 + $0x68] sm:$0xff] %v2081_v54  ;;  %2314 = vst [vmem:[%s3980_s29 + $0x78] sm:$0xff] %v2124_v62 }
 0x337   : > { %v2161_v63 = vpop.f32.mrb[4].mxu0  ;;  %v2204_v0 = vpop.f32.mrb[4].mxu1 }
 0x338   : > { %2303 = vst [vmem:[%s3980_s29 + $0x20] sm:$0xff] %v2161_v63  ;;  %2305 = vst [vmem:[%s3980_s29 + $0x30] sm:$0xff] %v2204_v0  ;;  %v2163_v1 = vpop.f32.mrb[5].mxu0  ;;  %v2206_v2 = vpop.f32.mrb[5].mxu1 }
 0x339   : > { %2304 = vst [vmem:[%s3980_s29 + $0x28] sm:$0xff] %v2163_v1  ;;  %2306 = vst [vmem:[%s3980_s29 + $0x38] sm:$0xff] %v2206_v2  ;;  %v2165_v3 = vpop.f32.mrb[6].mxu0  ;;  %v2208_v4 = vpop.f32.mrb[6].mxu1 }
 0x33a   : > { %2315 = vst [vmem:[%s3980_s29 + $0x80] sm:$0xff] %v2165_v3  ;;  %2317 = vst [vmem:[%s3980_s29 + $0x90] sm:$0xff] %v2208_v4  ;;  %v2167_v5 = vpop.f32.mrb[7].mxu0  ;;  %v2210_v6 = vpop.f32.mrb[7].mxu1 }
 0x33b   : > { %2316 = vst [vmem:[%s3980_s29 + $0x88] sm:$0xff] %v2167_v5  ;;  %2318 = vst [vmem:[%s3980_s29 + $0x98] sm:$0xff] %v2210_v6 }
 0x377   : > { %v2247_v36 = vpop.f32.mrb[8].mxu0  ;;  %v2290_v7 = vpop.f32.mrb[8].mxu1 }
 0x378   : > { %2307 = vst [vmem:[%s3980_s29 + $0x40] sm:$0xff] %v2247_v36  ;;  %2309 = vst [vmem:[%s3980_s29 + $0x50] sm:$0xff] %v2290_v7  ;;  %v2249_v8 = vpop.f32.mrb[9].mxu0  ;;  %v2292_v9 = vpop.f32.mrb[9].mxu1 }
 0x379   : > { %2308 = vst [vmem:[%s3980_s29 + $0x48] sm:$0xff] %v2249_v8  ;;  %2310 = vst [vmem:[%s3980_s29 + $0x58] sm:$0xff] %v2292_v9  ;;  %v2251_v10 = vpop.f32.mrb[10].mxu0  ;;  %v2294_v11 = vpop.f32.mrb[10].mxu1 }
 0x37a   : > { %2319 = vst [vmem:[%s3980_s29 + $0xa0] sm:$0xff] %v2251_v10  ;;  %2321 = vst [vmem:[%s3980_s29 + $0xb0] sm:$0xff] %v2294_v11  ;;  %v2253_v12 = vpop.f32.mrb[11].mxu0  ;;  %v2296_v13 = vpop.f32.mrb[11].mxu1 }
 0x37b   : > { %2320 = vst [vmem:[%s3980_s29 + $0xa8] sm:$0xff] %v2253_v12  ;;  %2322 = vst [vmem:[%s3980_s29 + $0xb8] sm:$0xff] %v2296_v13 }
 0x37c PF: > { %s4338_s1 = sld [smem:[#allocation18_spill]]  ;;  %s2337_s13 = sshll.u32 %s3980_s29, 4  ;;  %s4225_s13 = int_to_ptr.vmem [resolvable:$true] %s2337_s13 }
 0x37d   : > { %s4339_s4 = sld [smem:[#allocation24_spill]]  ;;  %s2324_s26 = scalar_lea.sflag [#allocation5], %s3895_s28 }
 0x37e   : > { %s3414_s5 = scalar_lea.vmem %s4225_s13, 3072  ;;  %p4340_p6 = scmp.ne.s32.totalorder %s4326_s6, 0 }
 0x37f   : > { %p3415_p0 = scmp.ne.s32.totalorder %s4225_s13, %s3414_s5  ;;  %s3561_s27 = smov [#allocation11]  }
 0x380   : > { %s3418_s30 = sshll.u32 %s3561_s27, 4  ;;  %s3419_s30 = int_to_ptr.vmem [resolvable:$false] %s3418_s30 }
 0x381   : > { %p3416_p13 = pnand %p3415_p0, %p4340_p6  ;;  %s3420_s21 = scalar_lea.vmem %s3419_s30, 6144 }
 0x382   : > { %s2779_s11 = smul.u32 3072, %s4338_s1  ;;  %p3421_p12 = scmp.lt.s32.totalorder %s4225_s13, %s3419_s30 }
 0x383   : > { %p3417_p11 = pneg %p3416_p13  ;;  %p3422_p3 = scmp.lt.s32.totalorder %s3420_s21, %s3414_s5 }
 0x384   : > { %s4223_s22 = scalar_lea.hbm %s4339_s4, %s2779_s11 }
 0x385   : > { %p3423_p8 = por %p3422_p3, %p3421_p12 }
 0x387   : > { %p3424_p5 = pnand %p3423_p8, %p3417_p11 }
 0x389   : > { %3427 = shalt.err (!%p3424_p5)
}
 0x38a   : > { %s3428_s12 = scalar_lea.hbm %s4223_s22, 3072  ;;  %s3432_s9 = scalar_lea.hbm %s4339_s4, 6144 }
 0x38b   : > { %p3429_p4 = scmp.ne.s32.totalorder %s4223_s22, %s3428_s12  ;;  %p3433_p1 = scmp.lt.u32.totalorder %s4223_s22, %s4339_s4 }
 0x38c   : > { %p3434_p10 = scmp.lt.u32.totalorder %s3432_s9, %s3428_s12  ;;  %p3436_p0 = scmp.lt.u32.totalorder %s3428_s12, %s4223_s22 }
 0x38d   : > { %p3430_p9 = pnand %p3429_p4, %p4340_p6 }
 0x38e   : > { %p3435_p7 = por %p3434_p10, %p3433_p1 }
 0x38f   : > { %p3431_p2 = pneg %p3430_p9 }
 0x390   : > { %p3437_p13 = por %p3436_p0, %p3435_p7 }
 0x392   : > { %p3438_p11 = pnand %p3437_p13, %p3431_p2 }
 0x394   : > { %3441 = shalt.err (!%p3438_p11)
}
 0x395   : > { %s3562_s11 = smov 1536   ;;  %s3563_s10 = smov 96  }
 0x396   : > { %2790 = dma.vmem_to_hbm [thread:$0]  (%p4340_p6), %s4225_s13, 3072, %s4223_s22, %s2324_s26, %s3562_s11, %s3562_s11, %s3563_s10  }
 0x397 PF: > { %p2813_p12 = scmp.ge.s32.totalorder %s3548_s25, 2  ;;  %s2352_s7 = sand.u32 1, %s3508_s15  }
 0x398   : > { %p4341_p3 = scmp.ne.s32.totalorder %s4318_s18, 0  ;;  %s2353_s5 = scalar_lea.sflag [#allocation5], %s2352_s7 }
 0x39a   : > { %p2807_p8 = pnand %p2813_p12, %p4341_p3 }
 0x39c   : > { %3503 = dma.done.wait (!%p2807_p8), %s2353_s5, 3072  }
 0x39d   : > { %3505 = vsyncadd (!%p2807_p8), %s2353_s5, 4294964224  ;;  %s24_s25 = sadd.s32 1, %s3548_s25   ;;  %s4342_s6 = sld [smem:[#allocation22_spill]] }
 0x39e   : > { %p21_p5 = scmp.ge.s32.totalorder %s24_s25, 10   ;;  %s4343_s21 = sld [smem:[#allocation19_spill]] }
 0x39f   : > { %s4344_s23 = sld [smem:[#allocation20_spill]]  ;;  %s4345_s28 = sld [smem:[#allocation21_spill]] }
 0x3a0   : > { %s4346_s15 = smov %s3512_s16  ;;  %s4347_s16 = smov %s3516_s17 }
 0x3a1   : > { %s4348_s17 = smov %s3793_s14  ;;  %s4349_s18 = smov %s3524_s19 }
 0x3a2   : > { %s4350_s19 = smov %s3528_s20  ;;  %s4352_s22 = smov %s3544_s24 }
 0x3a3   : > { %s4351_s20 = smov %s4342_s6  ;;  %23 = sbr.rel (!%p21_p5) target bundleno = 15 (0xf), region = 123 }
 0x3a5   : > { %s4353_s24 = smov %s4345_s28 }
 0x3aa   :  { %2358 = vsyncpa [#allocation4], 1 }
 0x3ab   :  { %2360 = vsyncpa [#allocation4 + $0x1], 1 }
 0x3ac   :  { %2361 = vsyncpa [#allocation7], 1 }
 0x3ad   :  { %2363 = vsyncpa [#allocation7 + $0x1], 1 }
 0x3ae   :  { %2364 = vsyncpa [#allocation10], 1 }
 0x3af   :  { %2366 = vsyncpa [#allocation10 + $0x1], 1 }
 0x3b0   :  { %2367 = vsyncpa [#allocation5], 1 }
 0x3b1   :  { %2369 = vsyncpa [#allocation5 + $0x1], 1 }

</bundles_post_ra>
